<compile_context>
chip_gen: v6e
topology: v6e:2x2x1
jax: 0.10.0
libtpu: 0.0.40
codegen_flags: <defaults>
</compile_context>

<pallas_src>
import functools

import jax
import jax.numpy as jnp
import numpy as np
from jax import lax
from jax.experimental import pallas as pl
from jax.experimental.pallas import tpu as pltpu

ALPHA = 0.25   # focal alpha (gamma == 2.0 is hard-coded as d*d)
LANE = 128


def _round_up(x, m):
    return -(-x // m) * m


def _newton_recip(x, eps=1e-10):
    """~f32-accurate reciprocal: EUP approx recip + one Newton step (cheap VPU)."""
    x = jnp.maximum(x, eps)
    r = pl.reciprocal(x, approx=True)
    return r * (2.0 - x * r)


# -------------------- Pallas kernel --------------------
def _loss_kernel(cls_p_ref, cls_t_ref, cnt_p_ref, cnt_t_ref,
                 reg_p_ref, reg_t_ref, out_ref, acc_ref, *, num_classes):
    si = pl.program_id(2)
    ns = pl.num_programs(2)

    @pl.when(si == 0)
    def _init():
        acc_ref[...] = jnp.zeros_like(acc_ref)

    cls_t = cls_t_ref[...].astype(jnp.float32)     # (TS,128) class ids, pad = -1
    cnt_p = cnt_p_ref[...].astype(jnp.float32)     # (TS,128) centerness logits
    cnt_t = cnt_t_ref[...].astype(jnp.float32)     # (TS,128) targets, pad/neg = -1

    valid = cls_t >= 0.0                 # real (non-padded) locations
    pos = cnt_t > -1.0                   # positive locations
    npos_l = jnp.sum(pos.astype(jnp.float32), axis=0, keepdims=True)   # (1,128)

    # ---- focal loss over ALL (valid) locations: loop over classes ----
    def class_body(c, focal_acc):
        x = cls_p_ref[c].astype(jnp.float32)                 # (TS,128)
        tgt = cls_t == (c + 1).astype(jnp.float32)
        w = jnp.where(tgt, ALPHA, 1.0 - ALPHA)
        # z = x for background class, -x for the target class; d = 1 - pt.
        z = jnp.where(tgt, -x, x)
        e = jnp.exp(-jnp.abs(z))                             # shared exponential
        denom = 1.0 + e
        r = pl.reciprocal(denom, approx=True)
        d = jnp.where(z >= 0.0, r, e * r)                    # sigmoid(z) = 1 - pt
        neg_log_pt = jnp.maximum(z, 0.0) + jnp.log(denom)    # softplus(z) = -log(pt)
        focal = w * (d * d) * neg_log_pt                     # gamma == 2.0
        return focal_acc + jnp.where(valid, focal, 0.0)

    focal_part = lax.fori_loop(0, num_classes, class_body,
                               jnp.zeros(cls_t.shape, jnp.float32),
                               unroll=min(4, num_classes))
    focal_l = jnp.sum(focal_part, axis=0, keepdims=True)                # (1,128)

    # ---- BCE-with-logits on positive locations ----
    bce = (jnp.maximum(cnt_p, 0.0) - cnt_p * cnt_t
           + jnp.log(1.0 + jnp.exp(-jnp.abs(cnt_p))))
    bce_l = jnp.sum(jnp.where(pos, bce, 0.0), axis=0, keepdims=True)    # (1,128)

    # ---- GIoU loss on positive locations (component-major planes) ----
    pL = reg_p_ref[0].astype(jnp.float32); pT = reg_p_ref[1].astype(jnp.float32)
    pR = reg_p_ref[2].astype(jnp.float32); pB = reg_p_ref[3].astype(jnp.float32)
    tL = reg_t_ref[0].astype(jnp.float32); tT = reg_t_ref[1].astype(jnp.float32)
    tR = reg_t_ref[2].astype(jnp.float32); tB = reg_t_ref[3].astype(jnp.float32)

    w_min = jnp.maximum(jnp.minimum(pR, tR) + jnp.minimum(pL, tL), 0.0)
    h_min = jnp.maximum(jnp.minimum(pB, tB) + jnp.minimum(pT, tT), 0.0)
    overlap = w_min * h_min
    area1 = (pR + pL) * (pB + pT)
    area2 = (tR + tL) * (tB + tT)
    union = area1 + area2 - overlap
    iou = overlap * _newton_recip(union)
    w_max = jnp.maximum(jnp.maximum(pR, tR) + jnp.maximum(pL, tL), 0.0)
    h_max = jnp.maximum(jnp.maximum(pB, tB) + jnp.maximum(pT, tT), 0.0)
    g_area = w_max * h_max
    giou = iou - (g_area - union) * _newton_recip(g_area)
    gloss = 1.0 - giou
    giou_l = jnp.sum(jnp.where(pos, gloss, 0.0), axis=0, keepdims=True)  # (1,128)

    # ---- accumulate lane-partials in scratch (rows 0..3 of an (8,128) vreg) ----
    row = lax.broadcasted_iota(jnp.int32, (8, LANE), 0)
    upd = jnp.where(row == 0, focal_l,
          jnp.where(row == 1, bce_l,
          jnp.where(row == 2, giou_l,
          jnp.where(row == 3, npos_l, 0.0))))
    acc_ref[...] += upd

    @pl.when(si == ns - 1)
    def _finalize():
        out_ref[...] = acc_ref[...]


# -------------------- wrapper --------------------
def _flatten_levels_cm(levels, s_pad, pad_value, dtype):
    """NCHW levels -> (B, C, s_pad) channel-major.

    Each level is cast to `dtype` BEFORE concatenation and the spatial pad is
    folded into the concat (single HBM pass over the big tensor, in `dtype`)."""
    b, c = int(levels[0].shape[0]), int(levels[0].shape[1])
    chunks = [p.reshape(p.shape[0], p.shape[1], -1).astype(dtype) for p in levels]
    s_total = sum(int(ch.shape[-1]) for ch in chunks)
    if s_pad > s_total:
        chunks.append(jnp.full((b, c, s_pad - s_total), pad_value, dtype))
    return jnp.concatenate(chunks, axis=-1)


def _pad_last(x, target, value):
    pad = target - x.shape[-1]
    if pad <= 0:
        return x
    widths = [(0, 0)] * (x.ndim - 1) + [(0, pad)]
    return jnp.pad(x, widths, constant_values=value)


def loss_forward(preds, targets, add_centerness=True,
                 cls_dma_dtype=jnp.bfloat16,
                 reg_dma_dtype=jnp.float32,   # set bf16 on v5e to cut reg DMA traffic
                 max_tile_sublanes=64,
                 ns_splits=None):
    cls_logits, cnt_logits, reg_preds = preds
    cls_targets, cnt_targets, reg_targets = targets

    B = int(cls_logits[0].shape[0])
    C = int(cls_logits[0].shape[1])
    S = int(cls_targets.shape[1])

    # ---- lane-dense tiling of the location axis (8-sublane aligned tiles) ----
    n_sub = _round_up(S, LANE) // LANE
    if ns_splits is None:
        # v7x: when the batch axis can't shard evenly across the 2 TensorCores,
        # split the location range into 2 parallel groups instead.
        ns_splits = 2 if (B % 2 == 1) else 1
    g = max(1, int(ns_splits))
    tsub = _round_up(min(max(1, int(max_tile_sublanes)), n_sub), 8)
    n_sub_pad = _round_up(n_sub, tsub * g)
    S_pad = n_sub_pad * LANE
    NSg = n_sub_pad // (tsub * g)       # grid steps per (batch, group)

    # ---- predictions: channel-major flatten, cast-before-pad, pad folded into concat ----
    cls_p = _flatten_levels_cm(cls_logits, S_pad, 0.0, cls_dma_dtype)       # (B,C,S_pad)
    cnt_p = _flatten_levels_cm(cnt_logits, S_pad, 0.0, jnp.float32)[:, 0]   # (B,S_pad)
    reg_p = _flatten_levels_cm(reg_preds, S_pad, 1.0, reg_dma_dtype)        # (B,4,S_pad)

    # ---- targets (small) ----
    cls_t = _pad_last(cls_targets[..., 0].astype(jnp.float32), S_pad, -1.0)   # (B,S_pad)
    cnt_t = _pad_last(cnt_targets[..., 0].astype(jnp.float32), S_pad, -1.0)   # (B,S_pad)
    reg_t = _pad_last(jnp.transpose(reg_targets, (0, 2, 1)).astype(reg_dma_dtype),
                      S_pad, 1.0)                                             # (B,4,S_pad)

    cls_p = cls_p.reshape(B, C, n_sub_pad, LANE)
    reg_p = reg_p.reshape(B, 4, n_sub_pad, LANE)
    reg_t = reg_t.reshape(B, 4, n_sub_pad, LANE)
    cnt_p = cnt_p.reshape(B, n_sub_pad, LANE)
    cls_t = cls_t.reshape(B, n_sub_pad, LANE)
    cnt_t = cnt_t.reshape(B, n_sub_pad, LANE)

    kernel = functools.partial(_loss_kernel, num_classes=C)

    out = pl.pallas_call(
        kernel,
        out_shape=jax.ShapeDtypeStruct((B * g, 8, LANE), jnp.float32),
        grid_spec=pltpu.PrefetchScalarGridSpec(
            num_scalar_prefetch=0,
            grid=(B, g, NSg),
            in_specs=[
                pl.BlockSpec((None, C, tsub, LANE),
                             lambda b, gg, s: (b, 0, gg * NSg + s, 0)),
                pl.BlockSpec((None, tsub, LANE),
                             lambda b, gg, s: (b, gg * NSg + s, 0)),
                pl.BlockSpec((None, tsub, LANE),
                             lambda b, gg, s: (b, gg * NSg + s, 0)),
                pl.BlockSpec((None, tsub, LANE),
                             lambda b, gg, s: (b, gg * NSg + s, 0)),
                pl.BlockSpec((None, 4, tsub, LANE),
                             lambda b, gg, s: (b, 0, gg * NSg + s, 0)),
                pl.BlockSpec((None, 4, tsub, LANE),
                             lambda b, gg, s: (b, 0, gg * NSg + s, 0)),
            ],
            out_specs=pl.BlockSpec((None, 8, LANE),
                                   lambda b, gg, s: (b * g + gg, 0, 0)),
            scratch_shapes=[pltpu.VMEM((8, LANE), jnp.float32)],
        ),
        compiler_params=pltpu.CompilerParams(
            dimension_semantics=("parallel", "parallel", "arbitrary"),
            vmem_limit_bytes=64 * 1024 * 1024),
    )(cls_p, cls_t, cnt_p, cnt_t, reg_p, reg_t)

    # finish: sum over groups and lanes (tiny), then /num_pos and batch-mean.
    part = out.reshape(B, g, 8, LANE)
    sums = jnp.sum(part[:, :, 0:4, :], axis=(1, 3))          # (B, 4)
    focal_s, bce_s, giou_s = sums[:, 0], sums[:, 1], sums[:, 2]
    num_pos = jnp.maximum(sums[:, 3], 1.0)

    cls_loss = jnp.mean(focal_s / num_pos)
    cnt_loss = jnp.mean(bce_s / num_pos)
    reg_loss = jnp.mean(giou_s / num_pos)

    if add_centerness:
        total_loss = cls_loss + cnt_loss + reg_loss
    else:
        total_loss = cls_loss + reg_loss + cnt_loss * 0.0
    return cls_loss, cnt_loss, reg_loss, total_loss


# -------------------- pure-JAX reference (mirrors PyTorch semantics) --------------------
def _flatten_levels_nhwc(levels):
    outs = []
    for p in levels:
        b, c, h, w = p.shape
        outs.append(jnp.transpose(p, (0, 2, 3, 1)).reshape(b, h * w, c))
    return jnp.concatenate(outs, axis=1)


def loss_reference(preds, targets, add_centerness=True):
    cls_logits, cnt_logits, reg_preds = preds
    cls_targets, cnt_targets, reg_targets = targets

    cls_p = _flatten_levels_nhwc(cls_logits).astype(jnp.float32)
    cnt_p = _flatten_levels_nhwc(cnt_logits).astype(jnp.float32)
    reg_p = _flatten_levels_nhwc(reg_preds).astype(jnp.float32)
    cls_t = cls_targets.astype(jnp.float32)
    cnt_t = cnt_targets.astype(jnp.float32)
    reg_t = reg_targets.astype(jnp.float32)

    B, S, C = cls_p.shape
    mask = cnt_t[..., 0] > -1.0
    num_pos = jnp.maximum(jnp.sum(mask.astype(jnp.float32), axis=1), 1.0)

    classes = jnp.arange(1, C + 1, dtype=jnp.float32)[None, None, :]
    onehot = (classes == cls_t).astype(jnp.float32)
    p = jax.nn.sigmoid(cls_p)
    pt = p * onehot + (1.0 - p) * (1.0 - onehot)
    w = ALPHA * onehot + (1.0 - ALPHA) * (1.0 - onehot)
    focal = -w * (1.0 - pt) ** 2 * jnp.log(pt)
    cls_loss = jnp.mean(jnp.sum(focal, axis=(1, 2)) / num_pos)

    x = cnt_p[..., 0]
    t = cnt_t[..., 0]
    bce = jnp.maximum(x, 0.0) - x * t + jnp.log(1.0 + jnp.exp(-jnp.abs(x)))
    cnt_loss = jnp.mean(jnp.sum(jnp.where(mask, bce, 0.0), axis=1) / num_pos)

    lt_min = jnp.minimum(reg_p[..., 0:2], reg_t[..., 0:2])
    rb_min = jnp.minimum(reg_p[..., 2:4], reg_t[..., 2:4])
    wh_min = jnp.maximum(rb_min + lt_min, 0.0)
    overlap = wh_min[..., 0] * wh_min[..., 1]
    area1 = (reg_p[..., 2] + reg_p[..., 0]) * (reg_p[..., 3] + reg_p[..., 1])
    area2 = (reg_t[..., 2] + reg_t[..., 0]) * (reg_t[..., 3] + reg_t[..., 1])
    union = area1 + area2 - overlap
    iou = overlap / union
    lt_max = jnp.maximum(reg_p[..., 0:2], reg_t[..., 0:2])
    rb_max = jnp.maximum(reg_p[..., 2:4], reg_t[..., 2:4])
    wh_max = jnp.maximum(rb_max + lt_max, 0.0)
    g_area = wh_max[..., 0] * wh_max[..., 1]
    giou = iou - (g_area - union) / jnp.maximum(g_area, 1e-10)
    gloss = 1.0 - giou
    reg_loss = jnp.mean(jnp.sum(jnp.where(mask, gloss, 0.0), axis=1) / num_pos)

    if add_centerness:
        total_loss = cls_loss + cnt_loss + reg_loss
    else:
        total_loss = cls_loss + reg_loss + cnt_loss * 0.0
    return cls_loss, cnt_loss, reg_loss, total_loss


# -------------------- demo --------------------
if __name__ == "__main__":
    B, C = 2, 4
    level_shapes = [(32, 32), (16, 16), (8, 8), (4, 4), (2, 2)]   # 5 pyramid levels
    S = sum(h * w for h, w in level_shapes)                       # 1364 locations

    key = jax.random.PRNGKey(0)
    keys = jax.random.split(key, 32)
    ki = iter(range(32))

    cls_logits = [jax.random.normal(keys[next(ki)], (B, C, h, w), jnp.float32)
                  for h, w in level_shapes]
    cnt_logits = [jax.random.normal(keys[next(ki)], (B, 1, h, w), jnp.float32)
                  for h, w in level_shapes]
    reg_preds = [jnp.abs(jax.random.normal(keys[next(ki)], (B, 4, h, w), jnp.float32)) * 4.0 + 0.1
                 for h, w in level_shapes]

    pos_mask = jax.random.bernoulli(keys[next(ki)], 0.3, (B, S))
    cls_targets = jnp.where(
        pos_mask,
        jax.random.randint(keys[next(ki)], (B, S), 1, C + 1),
        0).astype(jnp.float32)[..., None]                          # (B, S, 1)
    cnt_targets = jnp.where(
        pos_mask,
        jax.random.uniform(keys[next(ki)], (B, S), jnp.float32),
        -1.0)[..., None]                                           # (B, S, 1)
    reg_targets = jnp.where(
        pos_mask[..., None],
        jnp.abs(jax.random.normal(keys[next(ki)], (B, S, 4), jnp.float32)) * 4.0 + 0.1,
        -1.0)                                                      # (B, S, 4)

    preds = (cls_logits, cnt_logits, reg_preds)
    targets = (cls_targets, cnt_targets, reg_targets)

    ref = jax.block_until_ready(loss_reference(preds, targets, add_centerness=True))

    # 1) default config: one big S tile per batch element
    out1 = jax.block_until_ready(loss_forward(preds, targets, add_centerness=True))
    np.testing.assert_allclose(np.array(out1), np.array(ref), rtol=1e-2, atol=1e-2)

    # 2) multi-step accumulation along the location axis (exercise acc scratch)
    out2 = jax.block_until_ready(
        loss_forward(preds, targets, add_centerness=True, max_tile_sublanes=8))
    np.testing.assert_allclose(np.array(out2), np.array(ref), rtol=1e-2, atol=1e-2)

    # 3) v7x-style parallel split of the location range into 2 groups
    out3 = jax.block_until_ready(
        loss_forward(preds, targets, add_centerness=True,
                     max_tile_sublanes=8, ns_splits=2))
    np.testing.assert_allclose(np.array(out3), np.array(ref), rtol=1e-2, atol=1e-2)

    print("KERNEL_OK")
</pallas_src>

<mosaic_0001>
module attributes {stable_mosaic.version = 11 : i64} {
  func.func @_loss_kernel(%arg0: i32, %arg1: i32, %arg2: i32, %arg3: memref<1x4x16x128xbf16, #tpu.memory_space<vmem>>, %arg4: memref<1x16x128xf32, #tpu.memory_space<vmem>>, %arg5: memref<1x16x128xf32, #tpu.memory_space<vmem>>, %arg6: memref<1x16x128xf32, #tpu.memory_space<vmem>>, %arg7: memref<1x4x16x128xf32, #tpu.memory_space<vmem>>, %arg8: memref<1x4x16x128xf32, #tpu.memory_space<vmem>>, %arg9: memref<1x8x128xf32, #tpu.memory_space<vmem>>, %arg10: memref<8x128xf32, #tpu.memory_space<vmem>>) attributes {dimension_semantics = [#tpu.dimension_semantics<parallel>, #tpu.dimension_semantics<parallel>, #tpu.dimension_semantics<arbitrary>], iteration_bounds = array<i64: 2, 1, 1>, scalar_prefetch = 0 : i64, scratch_operands = 1 : i64, tpu.core_type = #tpu.core_type<tc>, window_params = [{transform_indices = @transform_0, window_bounds = array<i64: 1, 4, 16, 128>}, {transform_indices = @transform_1, window_bounds = array<i64: 1, 16, 128>}, {transform_indices = @transform_2, window_bounds = array<i64: 1, 16, 128>}, {transform_indices = @transform_3, window_bounds = array<i64: 1, 16, 128>}, {transform_indices = @transform_4, window_bounds = array<i64: 1, 4, 16, 128>}, {transform_indices = @transform_5, window_bounds = array<i64: 1, 4, 16, 128>}, {transform_indices = @transform_6, window_bounds = array<i64: 1, 8, 128>}]} {
    %c0_i32 = arith.constant 0 : i32
    %0 = arith.cmpi eq, %arg2, %c0_i32 : i32
    %1 = arith.extui %0 : i1 to i32
    %c0_i32_0 = arith.constant 0 : i32
    %2 = arith.cmpi ne, %1, %c0_i32_0 : i32
    scf.if %2 {
      %cst_118 = arith.constant 0.000000e+00 : f32
      %274 = vector.broadcast %cst_118 : f32 to vector<8x128xf32>
      %c0_119 = arith.constant 0 : index
      %c0_120 = arith.constant 0 : index
      %275 = vector.load %arg10[%c0_119, %c0_120] : memref<8x128xf32, #tpu.memory_space<vmem>>, vector<8x128xf32>
      tpu.vector_store %arg10[%c0_119, %c0_120], %274 {strides = array<i32>} : memref<8x128xf32, #tpu.memory_space<vmem>>, vector<8x128xf32>,
    } else {
    }
    %c0 = arith.constant 0 : index
    %c0_1 = arith.constant 0 : index
    %c0_2 = arith.constant 0 : index
    %3 = vector.load %arg4[%c0, %c0_1, %c0_2] : memref<1x16x128xf32, #tpu.memory_space<vmem>>, vector<1x16x128xf32>
    %4 = vector.shape_cast %3 : vector<1x16x128xf32> to vector<16x128xf32>
    %c0_3 = arith.constant 0 : index
    %c0_4 = arith.constant 0 : index
    %c0_5 = arith.constant 0 : index
    %5 = vector.load %arg5[%c0_3, %c0_4, %c0_5] : memref<1x16x128xf32, #tpu.memory_space<vmem>>, vector<1x16x128xf32>
    %6 = vector.shape_cast %5 : vector<1x16x128xf32> to vector<16x128xf32>
    %c0_6 = arith.constant 0 : index
    %c0_7 = arith.constant 0 : index
    %c0_8 = arith.constant 0 : index
    %7 = vector.load %arg6[%c0_6, %c0_7, %c0_8] : memref<1x16x128xf32, #tpu.memory_space<vmem>>, vector<1x16x128xf32>
    %8 = vector.shape_cast %7 : vector<1x16x128xf32> to vector<16x128xf32>
    %cst = arith.constant 0.000000e+00 : f32
    %9 = vector.broadcast %cst : f32 to vector<16x128xf32>
    %10 = arith.cmpf oge, %4, %9 : vector<16x128xf32>
    %cst_9 = arith.constant -1.000000e+00 : f32
    %11 = vector.broadcast %cst_9 : f32 to vector<16x128xf32>
    %12 = arith.cmpf ogt, %8, %11 : vector<16x128xf32>
    %13 = arith.extui %12 : vector<16x128xi1> to vector<16x128xi32>
    %14 = arith.sitofp %13 : vector<16x128xi32> to vector<16x128xf32>
    %cst_10 = arith.constant dense<0.000000e+00> : vector<128xf32>
    %15 = vector.multi_reduction <add>, %14, %cst_10 [0] : vector<16x128xf32> to vector<128xf32>
    %16 = vector.shape_cast %15 : vector<128xf32> to vector<1x128xf32>
    %cst_11 = arith.constant 0.000000e+00 : f32
    %17 = vector.broadcast %cst_11 : f32 to vector<16x128xf32>
    %c0_i32_12 = arith.constant 0 : i32
    %c0_13 = arith.constant 0 : index
    %18 = arith.index_cast %c0_i32_12 : i32 to index
    %c0_14 = arith.constant 0 : index
    %c0_15 = arith.constant 0 : index
    %19 = vector.load %arg3[%c0_13, %18, %c0_14, %c0_15] : memref<1x4x16x128xbf16, #tpu.memory_space<vmem>>, vector<1x1x16x128xbf16>
    %20 = vector.shape_cast %19 : vector<1x1x16x128xbf16> to vector<16x128xbf16>
    %21 = arith.extf %20 : vector<16x128xbf16> to vector<16x128xf32>
    %c1_i32 = arith.constant 1 : i32
    %22 = arith.addi %c0_i32_12, %c1_i32 : i32
    %23 = arith.sitofp %22 : i32 to f32
    %24 = vector.broadcast %23 : f32 to vector<16x128xf32>
    %25 = arith.cmpf oeq, %4, %24 : vector<16x128xf32>
    %cst_16 = arith.constant 2.500000e-01 : f32
    %cst_17 = arith.constant 7.500000e-01 : f32
    %26 = vector.broadcast %cst_16 : f32 to vector<16x128xf32>
    %27 = vector.broadcast %cst_17 : f32 to vector<16x128xf32>
    %28 = arith.select %25, %26, %27 : vector<16x128xi1>, vector<16x128xf32>
    %cst_18 = arith.constant 0.000000e+00 : f32
    %29 = vector.broadcast %cst_18 : f32 to vector<16x128xf32>
    %30 = arith.subf %29, %21 : vector<16x128xf32>
    %31 = arith.select %25, %30, %21 : vector<16x128xi1>, vector<16x128xf32>
    %32 = math.absf %31 : vector<16x128xf32>
    %cst_19 = arith.constant 0.000000e+00 : f32
    %33 = vector.broadcast %cst_19 : f32 to vector<16x128xf32>
    %34 = arith.subf %33, %32 : vector<16x128xf32>
    %35 = math.exp %34 : vector<16x128xf32>
    %cst_20 = arith.constant 1.000000e+00 : f32
    %36 = vector.broadcast %cst_20 : f32 to vector<16x128xf32>
    %37 = arith.addf %36, %35 : vector<16x128xf32>
    %38 = tpu.reciprocal %37 {approx = true} : vector<16x128xf32> -> vector<16x128xf32>
    %cst_21 = arith.constant 0.000000e+00 : f32
    %39 = vector.broadcast %cst_21 : f32 to vector<16x128xf32>
    %40 = arith.cmpf oge, %31, %39 : vector<16x128xf32>
    %41 = arith.mulf %35, %38 : vector<16x128xf32>
    %42 = arith.select %40, %38, %41 : vector<16x128xi1>, vector<16x128xf32>
    %cst_22 = arith.constant 0.000000e+00 : f32
    %43 = vector.broadcast %cst_22 : f32 to vector<16x128xf32>
    %44 = arith.maximumf %31, %43 : vector<16x128xf32>
    %45 = math.log %37 : vector<16x128xf32>
    %46 = arith.addf %44, %45 : vector<16x128xf32>
    %47 = arith.mulf %42, %42 : vector<16x128xf32>
    %48 = arith.mulf %28, %47 : vector<16x128xf32>
    %49 = arith.mulf %48, %46 : vector<16x128xf32>
    %cst_23 = arith.constant 0.000000e+00 : f32
    %50 = vector.broadcast %cst_23 : f32 to vector<16x128xf32>
    %51 = arith.select %10, %49, %50 : vector<16x128xi1>, vector<16x128xf32>
    %52 = arith.addf %17, %51 : vector<16x128xf32>
    %c1_i32_24 = arith.constant 1 : i32
    %c0_25 = arith.constant 0 : index
    %53 = arith.index_cast %c1_i32_24 : i32 to index
    %c0_26 = arith.constant 0 : index
    %c0_27 = arith.constant 0 : index
    %54 = vector.load %arg3[%c0_25, %53, %c0_26, %c0_27] : memref<1x4x16x128xbf16, #tpu.memory_space<vmem>>, vector<1x1x16x128xbf16>
    %55 = vector.shape_cast %54 : vector<1x1x16x128xbf16> to vector<16x128xbf16>
    %56 = arith.extf %55 : vector<16x128xbf16> to vector<16x128xf32>
    %c1_i32_28 = arith.constant 1 : i32
    %57 = arith.addi %c1_i32_24, %c1_i32_28 : i32
    %58 = arith.sitofp %57 : i32 to f32
    %59 = vector.broadcast %58 : f32 to vector<16x128xf32>
    %60 = arith.cmpf oeq, %4, %59 : vector<16x128xf32>
    %cst_29 = arith.constant 2.500000e-01 : f32
    %cst_30 = arith.constant 7.500000e-01 : f32
    %61 = vector.broadcast %cst_29 : f32 to vector<16x128xf32>
    %62 = vector.broadcast %cst_30 : f32 to vector<16x128xf32>
    %63 = arith.select %60, %61, %62 : vector<16x128xi1>, vector<16x128xf32>
    %cst_31 = arith.constant 0.000000e+00 : f32
    %64 = vector.broadcast %cst_31 : f32 to vector<16x128xf32>
    %65 = arith.subf %64, %56 : vector<16x128xf32>
    %66 = arith.select %60, %65, %56 : vector<16x128xi1>, vector<16x128xf32>
    %67 = math.absf %66 : vector<16x128xf32>
    %cst_32 = arith.constant 0.000000e+00 : f32
    %68 = vector.broadcast %cst_32 : f32 to vector<16x128xf32>
    %69 = arith.subf %68, %67 : vector<16x128xf32>
    %70 = math.exp %69 : vector<16x128xf32>
    %cst_33 = arith.constant 1.000000e+00 : f32
    %71 = vector.broadcast %cst_33 : f32 to vector<16x128xf32>
    %72 = arith.addf %71, %70 : vector<16x128xf32>
    %73 = tpu.reciprocal %72 {approx = true} : vector<16x128xf32> -> vector<16x128xf32>
    %cst_34 = arith.constant 0.000000e+00 : f32
    %74 = vector.broadcast %cst_34 : f32 to vector<16x128xf32>
    %75 = arith.cmpf oge, %66, %74 : vector<16x128xf32>
    %76 = arith.mulf %70, %73 : vector<16x128xf32>
    %77 = arith.select %75, %73, %76 : vector<16x128xi1>, vector<16x128xf32>
    %cst_35 = arith.constant 0.000000e+00 : f32
    %78 = vector.broadcast %cst_35 : f32 to vector<16x128xf32>
    %79 = arith.maximumf %66, %78 : vector<16x128xf32>
    %80 = math.log %72 : vector<16x128xf32>
    %81 = arith.addf %79, %80 : vector<16x128xf32>
    %82 = arith.mulf %77, %77 : vector<16x128xf32>
    %83 = arith.mulf %63, %82 : vector<16x128xf32>
    %84 = arith.mulf %83, %81 : vector<16x128xf32>
    %cst_36 = arith.constant 0.000000e+00 : f32
    %85 = vector.broadcast %cst_36 : f32 to vector<16x128xf32>
    %86 = arith.select %10, %84, %85 : vector<16x128xi1>, vector<16x128xf32>
    %87 = arith.addf %52, %86 : vector<16x128xf32>
    %c2_i32 = arith.constant 2 : i32
    %c0_37 = arith.constant 0 : index
    %88 = arith.index_cast %c2_i32 : i32 to index
    %c0_38 = arith.constant 0 : index
    %c0_39 = arith.constant 0 : index
    %89 = vector.load %arg3[%c0_37, %88, %c0_38, %c0_39] : memref<1x4x16x128xbf16, #tpu.memory_space<vmem>>, vector<1x1x16x128xbf16>
    %90 = vector.shape_cast %89 : vector<1x1x16x128xbf16> to vector<16x128xbf16>
    %91 = arith.extf %90 : vector<16x128xbf16> to vector<16x128xf32>
    %c1_i32_40 = arith.constant 1 : i32
    %92 = arith.addi %c2_i32, %c1_i32_40 : i32
    %93 = arith.sitofp %92 : i32 to f32
    %94 = vector.broadcast %93 : f32 to vector<16x128xf32>
    %95 = arith.cmpf oeq, %4, %94 : vector<16x128xf32>
    %cst_41 = arith.constant 2.500000e-01 : f32
    %cst_42 = arith.constant 7.500000e-01 : f32
    %96 = vector.broadcast %cst_41 : f32 to vector<16x128xf32>
    %97 = vector.broadcast %cst_42 : f32 to vector<16x128xf32>
    %98 = arith.select %95, %96, %97 : vector<16x128xi1>, vector<16x128xf32>
    %cst_43 = arith.constant 0.000000e+00 : f32
    %99 = vector.broadcast %cst_43 : f32 to vector<16x128xf32>
    %100 = arith.subf %99, %91 : vector<16x128xf32>
    %101 = arith.select %95, %100, %91 : vector<16x128xi1>, vector<16x128xf32>
    %102 = math.absf %101 : vector<16x128xf32>
    %cst_44 = arith.constant 0.000000e+00 : f32
    %103 = vector.broadcast %cst_44 : f32 to vector<16x128xf32>
    %104 = arith.subf %103, %102 : vector<16x128xf32>
    %105 = math.exp %104 : vector<16x128xf32>
    %cst_45 = arith.constant 1.000000e+00 : f32
    %106 = vector.broadcast %cst_45 : f32 to vector<16x128xf32>
    %107 = arith.addf %106, %105 : vector<16x128xf32>
    %108 = tpu.reciprocal %107 {approx = true} : vector<16x128xf32> -> vector<16x128xf32>
    %cst_46 = arith.constant 0.000000e+00 : f32
    %109 = vector.broadcast %cst_46 : f32 to vector<16x128xf32>
    %110 = arith.cmpf oge, %101, %109 : vector<16x128xf32>
    %111 = arith.mulf %105, %108 : vector<16x128xf32>
    %112 = arith.select %110, %108, %111 : vector<16x128xi1>, vector<16x128xf32>
    %cst_47 = arith.constant 0.000000e+00 : f32
    %113 = vector.broadcast %cst_47 : f32 to vector<16x128xf32>
    %114 = arith.maximumf %101, %113 : vector<16x128xf32>
    %115 = math.log %107 : vector<16x128xf32>
    %116 = arith.addf %114, %115 : vector<16x128xf32>
    %117 = arith.mulf %112, %112 : vector<16x128xf32>
    %118 = arith.mulf %98, %117 : vector<16x128xf32>
    %119 = arith.mulf %118, %116 : vector<16x128xf32>
    %cst_48 = arith.constant 0.000000e+00 : f32
    %120 = vector.broadcast %cst_48 : f32 to vector<16x128xf32>
    %121 = arith.select %10, %119, %120 : vector<16x128xi1>, vector<16x128xf32>
    %122 = arith.addf %87, %121 : vector<16x128xf32>
    %c3_i32 = arith.constant 3 : i32
    %c0_49 = arith.constant 0 : index
    %123 = arith.index_cast %c3_i32 : i32 to index
    %c0_50 = arith.constant 0 : index
    %c0_51 = arith.constant 0 : index
    %124 = vector.load %arg3[%c0_49, %123, %c0_50, %c0_51] : memref<1x4x16x128xbf16, #tpu.memory_space<vmem>>, vector<1x1x16x128xbf16>
    %125 = vector.shape_cast %124 : vector<1x1x16x128xbf16> to vector<16x128xbf16>
    %126 = arith.extf %125 : vector<16x128xbf16> to vector<16x128xf32>
    %c1_i32_52 = arith.constant 1 : i32
    %127 = arith.addi %c3_i32, %c1_i32_52 : i32
    %128 = arith.sitofp %127 : i32 to f32
    %129 = vector.broadcast %128 : f32 to vector<16x128xf32>
    %130 = arith.cmpf oeq, %4, %129 : vector<16x128xf32>
    %cst_53 = arith.constant 2.500000e-01 : f32
    %cst_54 = arith.constant 7.500000e-01 : f32
    %131 = vector.broadcast %cst_53 : f32 to vector<16x128xf32>
    %132 = vector.broadcast %cst_54 : f32 to vector<16x128xf32>
    %133 = arith.select %130, %131, %132 : vector<16x128xi1>, vector<16x128xf32>
    %cst_55 = arith.constant 0.000000e+00 : f32
    %134 = vector.broadcast %cst_55 : f32 to vector<16x128xf32>
    %135 = arith.subf %134, %126 : vector<16x128xf32>
    %136 = arith.select %130, %135, %126 : vector<16x128xi1>, vector<16x128xf32>
    %137 = math.absf %136 : vector<16x128xf32>
    %cst_56 = arith.constant 0.000000e+00 : f32
    %138 = vector.broadcast %cst_56 : f32 to vector<16x128xf32>
    %139 = arith.subf %138, %137 : vector<16x128xf32>
    %140 = math.exp %139 : vector<16x128xf32>
    %cst_57 = arith.constant 1.000000e+00 : f32
    %141 = vector.broadcast %cst_57 : f32 to vector<16x128xf32>
    %142 = arith.addf %141, %140 : vector<16x128xf32>
    %143 = tpu.reciprocal %142 {approx = true} : vector<16x128xf32> -> vector<16x128xf32>
    %cst_58 = arith.constant 0.000000e+00 : f32
    %144 = vector.broadcast %cst_58 : f32 to vector<16x128xf32>
    %145 = arith.cmpf oge, %136, %144 : vector<16x128xf32>
    %146 = arith.mulf %140, %143 : vector<16x128xf32>
    %147 = arith.select %145, %143, %146 : vector<16x128xi1>, vector<16x128xf32>
    %cst_59 = arith.constant 0.000000e+00 : f32
    %148 = vector.broadcast %cst_59 : f32 to vector<16x128xf32>
    %149 = arith.maximumf %136, %148 : vector<16x128xf32>
    %150 = math.log %142 : vector<16x128xf32>
    %151 = arith.addf %149, %150 : vector<16x128xf32>
    %152 = arith.mulf %147, %147 : vector<16x128xf32>
    %153 = arith.mulf %133, %152 : vector<16x128xf32>
    %154 = arith.mulf %153, %151 : vector<16x128xf32>
    %cst_60 = arith.constant 0.000000e+00 : f32
    %155 = vector.broadcast %cst_60 : f32 to vector<16x128xf32>
    %156 = arith.select %10, %154, %155 : vector<16x128xi1>, vector<16x128xf32>
    %157 = arith.addf %122, %156 : vector<16x128xf32>
    %c4_i32 = arith.constant 4 : i32
    %cst_61 = arith.constant dense<0.000000e+00> : vector<128xf32>
    %158 = vector.multi_reduction <add>, %157, %cst_61 [0] : vector<16x128xf32> to vector<128xf32>
    %159 = vector.shape_cast %158 : vector<128xf32> to vector<1x128xf32>
    %cst_62 = arith.constant 0.000000e+00 : f32
    %160 = vector.broadcast %cst_62 : f32 to vector<16x128xf32>
    %161 = arith.maximumf %6, %160 : vector<16x128xf32>
    %162 = arith.mulf %6, %8 : vector<16x128xf32>
    %163 = arith.subf %161, %162 : vector<16x128xf32>
    %164 = math.absf %6 : vector<16x128xf32>
    %cst_63 = arith.constant 0.000000e+00 : f32
    %165 = vector.broadcast %cst_63 : f32 to vector<16x128xf32>
    %166 = arith.subf %165, %164 : vector<16x128xf32>
    %167 = math.exp %166 : vector<16x128xf32>
    %cst_64 = arith.constant 1.000000e+00 : f32
    %168 = vector.broadcast %cst_64 : f32 to vector<16x128xf32>
    %169 = arith.addf %168, %167 : vector<16x128xf32>
    %170 = math.log %169 : vector<16x128xf32>
    %171 = arith.addf %163, %170 : vector<16x128xf32>
    %cst_65 = arith.constant 0.000000e+00 : f32
    %172 = vector.broadcast %cst_65 : f32 to vector<16x128xf32>
    %173 = arith.select %12, %171, %172 : vector<16x128xi1>, vector<16x128xf32>
    %cst_66 = arith.constant dense<0.000000e+00> : vector<128xf32>
    %174 = vector.multi_reduction <add>, %173, %cst_66 [0] : vector<16x128xf32> to vector<128xf32>
    %175 = vector.shape_cast %174 : vector<128xf32> to vector<1x128xf32>
    %c0_67 = arith.constant 0 : index
    %c0_68 = arith.constant 0 : index
    %c0_69 = arith.constant 0 : index
    %c0_70 = arith.constant 0 : index
    %176 = vector.load %arg7[%c0_67, %c0_68, %c0_69, %c0_70] : memref<1x4x16x128xf32, #tpu.memory_space<vmem>>, vector<1x1x16x128xf32>
    %177 = vector.shape_cast %176 : vector<1x1x16x128xf32> to vector<16x128xf32>
    %c0_71 = arith.constant 0 : index
    %c1 = arith.constant 1 : index
    %c0_72 = arith.constant 0 : index
    %c0_73 = arith.constant 0 : index
    %178 = vector.load %arg7[%c0_71, %c1, %c0_72, %c0_73] : memref<1x4x16x128xf32, #tpu.memory_space<vmem>>, vector<1x1x16x128xf32>
    %179 = vector.shape_cast %178 : vector<1x1x16x128xf32> to vector<16x128xf32>
    %c0_74 = arith.constant 0 : index
    %c2 = arith.constant 2 : index
    %c0_75 = arith.constant 0 : index
    %c0_76 = arith.constant 0 : index
    %180 = vector.load %arg7[%c0_74, %c2, %c0_75, %c0_76] : memref<1x4x16x128xf32, #tpu.memory_space<vmem>>, vector<1x1x16x128xf32>
    %181 = vector.shape_cast %180 : vector<1x1x16x128xf32> to vector<16x128xf32>
    %c0_77 = arith.constant 0 : index
    %c3 = arith.constant 3 : index
    %c0_78 = arith.constant 0 : index
    %c0_79 = arith.constant 0 : index
    %182 = vector.load %arg7[%c0_77, %c3, %c0_78, %c0_79] : memref<1x4x16x128xf32, #tpu.memory_space<vmem>>, vector<1x1x16x128xf32>
    %183 = vector.shape_cast %182 : vector<1x1x16x128xf32> to vector<16x128xf32>
    %c0_80 = arith.constant 0 : index
    %c0_81 = arith.constant 0 : index
    %c0_82 = arith.constant 0 : index
    %c0_83 = arith.constant 0 : index
    %184 = vector.load %arg8[%c0_80, %c0_81, %c0_82, %c0_83] : memref<1x4x16x128xf32, #tpu.memory_space<vmem>>, vector<1x1x16x128xf32>
    %185 = vector.shape_cast %184 : vector<1x1x16x128xf32> to vector<16x128xf32>
    %c0_84 = arith.constant 0 : index
    %c1_85 = arith.constant 1 : index
    %c0_86 = arith.constant 0 : index
    %c0_87 = arith.constant 0 : index
    %186 = vector.load %arg8[%c0_84, %c1_85, %c0_86, %c0_87] : memref<1x4x16x128xf32, #tpu.memory_space<vmem>>, vector<1x1x16x128xf32>
    %187 = vector.shape_cast %186 : vector<1x1x16x128xf32> to vector<16x128xf32>
    %c0_88 = arith.constant 0 : index
    %c2_89 = arith.constant 2 : index
    %c0_90 = arith.constant 0 : index
    %c0_91 = arith.constant 0 : index
    %188 = vector.load %arg8[%c0_88, %c2_89, %c0_90, %c0_91] : memref<1x4x16x128xf32, #tpu.memory_space<vmem>>, vector<1x1x16x128xf32>
    %189 = vector.shape_cast %188 : vector<1x1x16x128xf32> to vector<16x128xf32>
    %c0_92 = arith.constant 0 : index
    %c3_93 = arith.constant 3 : index
    %c0_94 = arith.constant 0 : index
    %c0_95 = arith.constant 0 : index
    %190 = vector.load %arg8[%c0_92, %c3_93, %c0_94, %c0_95] : memref<1x4x16x128xf32, #tpu.memory_space<vmem>>, vector<1x1x16x128xf32>
    %191 = vector.shape_cast %190 : vector<1x1x16x128xf32> to vector<16x128xf32>
    %192 = arith.minimumf %181, %189 : vector<16x128xf32>
    %193 = arith.minimumf %177, %185 : vector<16x128xf32>
    %194 = arith.addf %192, %193 : vector<16x128xf32>
    %cst_96 = arith.constant 0.000000e+00 : f32
    %195 = vector.broadcast %cst_96 : f32 to vector<16x128xf32>
    %196 = arith.maximumf %194, %195 : vector<16x128xf32>
    %197 = arith.minimumf %183, %191 : vector<16x128xf32>
    %198 = arith.minimumf %179, %187 : vector<16x128xf32>
    %199 = arith.addf %197, %198 : vector<16x128xf32>
    %cst_97 = arith.constant 0.000000e+00 : f32
    %200 = vector.broadcast %cst_97 : f32 to vector<16x128xf32>
    %201 = arith.maximumf %199, %200 : vector<16x128xf32>
    %202 = arith.mulf %196, %201 : vector<16x128xf32>
    %203 = arith.addf %181, %177 : vector<16x128xf32>
    %204 = arith.addf %183, %179 : vector<16x128xf32>
    %205 = arith.mulf %203, %204 : vector<16x128xf32>
    %206 = arith.addf %189, %185 : vector<16x128xf32>
    %207 = arith.addf %191, %187 : vector<16x128xf32>
    %208 = arith.mulf %206, %207 : vector<16x128xf32>
    %209 = arith.addf %205, %208 : vector<16x128xf32>
    %210 = arith.subf %209, %202 : vector<16x128xf32>
    %cst_98 = arith.constant 1.000000e-10 : f32
    %211 = vector.broadcast %cst_98 : f32 to vector<16x128xf32>
    %212 = arith.maximumf %210, %211 : vector<16x128xf32>
    %213 = tpu.reciprocal %212 {approx = true} : vector<16x128xf32> -> vector<16x128xf32>
    %214 = arith.mulf %212, %213 : vector<16x128xf32>
    %cst_99 = arith.constant 2.000000e+00 : f32
    %215 = vector.broadcast %cst_99 : f32 to vector<16x128xf32>
    %216 = arith.subf %215, %214 : vector<16x128xf32>
    %217 = arith.mulf %213, %216 : vector<16x128xf32>
    %218 = arith.mulf %202, %217 : vector<16x128xf32>
    %219 = arith.maximumf %181, %189 : vector<16x128xf32>
    %220 = arith.maximumf %177, %185 : vector<16x128xf32>
    %221 = arith.addf %219, %220 : vector<16x128xf32>
    %cst_100 = arith.constant 0.000000e+00 : f32
    %222 = vector.broadcast %cst_100 : f32 to vector<16x128xf32>
    %223 = arith.maximumf %221, %222 : vector<16x128xf32>
    %224 = arith.maximumf %183, %191 : vector<16x128xf32>
    %225 = arith.maximumf %179, %187 : vector<16x128xf32>
    %226 = arith.addf %224, %225 : vector<16x128xf32>
    %cst_101 = arith.constant 0.000000e+00 : f32
    %227 = vector.broadcast %cst_101 : f32 to vector<16x128xf32>
    %228 = arith.maximumf %226, %227 : vector<16x128xf32>
    %229 = arith.mulf %223, %228 : vector<16x128xf32>
    %230 = arith.subf %229, %210 : vector<16x128xf32>
    %cst_102 = arith.constant 1.000000e-10 : f32
    %231 = vector.broadcast %cst_102 : f32 to vector<16x128xf32>
    %232 = arith.maximumf %229, %231 : vector<16x128xf32>
    %233 = tpu.reciprocal %232 {approx = true} : vector<16x128xf32> -> vector<16x128xf32>
    %234 = arith.mulf %232, %233 : vector<16x128xf32>
    %cst_103 = arith.constant 2.000000e+00 : f32
    %235 = vector.broadcast %cst_103 : f32 to vector<16x128xf32>
    %236 = arith.subf %235, %234 : vector<16x128xf32>
    %237 = arith.mulf %233, %236 : vector<16x128xf32>
    %238 = arith.mulf %230, %237 : vector<16x128xf32>
    %239 = arith.subf %218, %238 : vector<16x128xf32>
    %cst_104 = arith.constant 1.000000e+00 : f32
    %240 = vector.broadcast %cst_104 : f32 to vector<16x128xf32>
    %241 = arith.subf %240, %239 : vector<16x128xf32>
    %cst_105 = arith.constant 0.000000e+00 : f32
    %242 = vector.broadcast %cst_105 : f32 to vector<16x128xf32>
    %243 = arith.select %12, %241, %242 : vector<16x128xi1>, vector<16x128xf32>
    %cst_106 = arith.constant dense<0.000000e+00> : vector<128xf32>
    %244 = vector.multi_reduction <add>, %243, %cst_106 [0] : vector<16x128xf32> to vector<128xf32>
    %245 = vector.shape_cast %244 : vector<128xf32> to vector<1x128xf32>
    %246 = tpu.iota {dimensions = array<i32: 0>} : vector<8x128xi32>
    %c0_i32_107 = arith.constant 0 : i32
    %247 = vector.broadcast %c0_i32_107 : i32 to vector<8x128xi32>
    %248 = arith.cmpi eq, %246, %247 : vector<8x128xi32>
    %c1_i32_108 = arith.constant 1 : i32
    %249 = vector.broadcast %c1_i32_108 : i32 to vector<8x128xi32>
    %250 = arith.cmpi eq, %246, %249 : vector<8x128xi32>
    %c2_i32_109 = arith.constant 2 : i32
    %251 = vector.broadcast %c2_i32_109 : i32 to vector<8x128xi32>
    %252 = arith.cmpi eq, %246, %251 : vector<8x128xi32>
    %c3_i32_110 = arith.constant 3 : i32
    %253 = vector.broadcast %c3_i32_110 : i32 to vector<8x128xi32>
    %254 = arith.cmpi eq, %246, %253 : vector<8x128xi32>
    %cst_111 = arith.constant 0.000000e+00 : f32
    %255 = vector.shape_cast %16 : vector<1x128xf32> to vector<1x128xf32>
    %256 = vector.broadcast %255 : vector<1x128xf32> to vector<8x128xf32>
    %257 = vector.broadcast %cst_111 : f32 to vector<8x128xf32>
    %258 = arith.select %254, %256, %257 : vector<8x128xi1>, vector<8x128xf32>
    %259 = vector.shape_cast %245 : vector<1x128xf32> to vector<1x128xf32>
    %260 = vector.broadcast %259 : vector<1x128xf32> to vector<8x128xf32>
    %261 = arith.select %252, %260, %258 : vector<8x128xi1>, vector<8x128xf32>
    %262 = vector.shape_cast %175 : vector<1x128xf32> to vector<1x128xf32>
    %263 = vector.broadcast %262 : vector<1x128xf32> to vector<8x128xf32>
    %264 = arith.select %250, %263, %261 : vector<8x128xi1>, vector<8x128xf32>
    %265 = vector.shape_cast %159 : vector<1x128xf32> to vector<1x128xf32>
    %266 = vector.broadcast %265 : vector<1x128xf32> to vector<8x128xf32>
    %267 = arith.select %248, %266, %264 : vector<8x128xi1>, vector<8x128xf32>
    %c0_112 = arith.constant 0 : index
    %c0_113 = arith.constant 0 : index
    %268 = vector.load %arg10[%c0_112, %c0_113] : memref<8x128xf32, #tpu.memory_space<vmem>>, vector<8x128xf32>
    %269 = arith.addf %268, %267 : vector<8x128xf32>
    %c0_114 = arith.constant 0 : index
    %c0_115 = arith.constant 0 : index
    %270 = vector.load %arg10[%c0_114, %c0_115] : memref<8x128xf32, #tpu.memory_space<vmem>>, vector<8x128xf32>
    tpu.vector_store %arg10[%c0_114, %c0_115], %269 {strides = array<i32>} : memref<8x128xf32, #tpu.memory_space<vmem>>, vector<8x128xf32>,
    %c0_i32_116 = arith.constant 0 : i32
    %271 = arith.cmpi eq, %arg2, %c0_i32_116 : i32
    %272 = arith.extui %271 : i1 to i32
    %c0_i32_117 = arith.constant 0 : i32
    %273 = arith.cmpi ne, %272, %c0_i32_117 : i32
    scf.if %273 {
      %c0_118 = arith.constant 0 : index
      %c0_119 = arith.constant 0 : index
      %274 = vector.load %arg10[%c0_118, %c0_119] : memref<8x128xf32, #tpu.memory_space<vmem>>, vector<8x128xf32>
      %c0_120 = arith.constant 0 : index
      %c0_121 = arith.constant 0 : index
      %c0_122 = arith.constant 0 : index
      %275 = vector.load %arg9[%c0_120, %c0_121, %c0_122] : memref<1x8x128xf32, #tpu.memory_space<vmem>>, vector<1x8x128xf32>
      %276 = vector.shape_cast %275 : vector<1x8x128xf32> to vector<8x128xf32>
      %277 = vector.shape_cast %274 : vector<8x128xf32> to vector<1x8x128xf32>
      tpu.vector_store %arg9[%c0_120, %c0_121, %c0_122], %277 {strides = array<i32>} : memref<1x8x128xf32, #tpu.memory_space<vmem>>, vector<1x8x128xf32>,
    } else {
    }
    return
  }
  func.func @transform_0(%arg0: i32, %arg1: i32, %arg2: i32) -> (i32, i32, i32, i32) {
    %c1_i32 = arith.constant 1 : i32
    %0 = arith.muli %arg1, %c1_i32 : i32
    %1 = arith.addi %0, %arg2 : i32
    %c0_i32 = arith.constant 0 : i32
    %c0_i32_0 = arith.constant 0 : i32
    %c0_i32_1 = arith.constant 0 : i32
    return %arg0, %c0_i32, %1, %c0_i32_0 : i32, i32, i32, i32
  }
  func.func @transform_1(%arg0: i32, %arg1: i32, %arg2: i32) -> (i32, i32, i32) {
    %c1_i32 = arith.constant 1 : i32
    %0 = arith.muli %arg1, %c1_i32 : i32
    %1 = arith.addi %0, %arg2 : i32
    %c0_i32 = arith.constant 0 : i32
    %c0_i32_0 = arith.constant 0 : i32
    return %arg0, %1, %c0_i32 : i32, i32, i32
  }
  func.func @transform_2(%arg0: i32, %arg1: i32, %arg2: i32) -> (i32, i32, i32) {
    %c1_i32 = arith.constant 1 : i32
    %0 = arith.muli %arg1, %c1_i32 : i32
    %1 = arith.addi %0, %arg2 : i32
    %c0_i32 = arith.constant 0 : i32
    %c0_i32_0 = arith.constant 0 : i32
    return %arg0, %1, %c0_i32 : i32, i32, i32
  }
  func.func @transform_3(%arg0: i32, %arg1: i32, %arg2: i32) -> (i32, i32, i32) {
    %c1_i32 = arith.constant 1 : i32
    %0 = arith.muli %arg1, %c1_i32 : i32
    %1 = arith.addi %0, %arg2 : i32
    %c0_i32 = arith.constant 0 : i32
    %c0_i32_0 = arith.constant 0 : i32
    return %arg0, %1, %c0_i32 : i32, i32, i32
  }
  func.func @transform_4(%arg0: i32, %arg1: i32, %arg2: i32) -> (i32, i32, i32, i32) {
    %c1_i32 = arith.constant 1 : i32
    %0 = arith.muli %arg1, %c1_i32 : i32
    %1 = arith.addi %0, %arg2 : i32
    %c0_i32 = arith.constant 0 : i32
    %c0_i32_0 = arith.constant 0 : i32
    %c0_i32_1 = arith.constant 0 : i32
    return %arg0, %c0_i32, %1, %c0_i32_0 : i32, i32, i32, i32
  }
  func.func @transform_5(%arg0: i32, %arg1: i32, %arg2: i32) -> (i32, i32, i32, i32) {
    %c1_i32 = arith.constant 1 : i32
    %0 = arith.muli %arg1, %c1_i32 : i32
    %1 = arith.addi %0, %arg2 : i32
    %c0_i32 = arith.constant 0 : i32
    %c0_i32_0 = arith.constant 0 : i32
    %c0_i32_1 = arith.constant 0 : i32
    return %arg0, %c0_i32, %1, %c0_i32_0 : i32, i32, i32, i32
  }
  func.func @transform_6(%arg0: i32, %arg1: i32, %arg2: i32) -> (i32, i32, i32) {
    %c1_i32 = arith.constant 1 : i32
    %0 = arith.muli %arg0, %c1_i32 : i32
    %1 = arith.addi %0, %arg1 : i32
    %c0_i32 = arith.constant 0 : i32
    %c0_i32_0 = arith.constant 0 : i32
    %c0_i32_1 = arith.constant 0 : i32
    return %1, %c0_i32, %c0_i32_0 : i32, i32, i32
  }
}

</mosaic_0001>

<bundles_post_ra>
// kernel: tpu_custom_call.1
= control target key start
LH: loop header
LB: loop body
LE: loop exit
PB: predicated region body
PF: predicated region fallthrough
CT: control target
= control target key end

     0   :  { %s2342_s0 = inlined_call_operand.hbm [shape: bf16[2,4,16,128], index: 0, kind: input, shape index: {}]   ;;  %s2343_s1 = inlined_call_operand.hbm [shape: f32[2,16,128], index: 1, kind: input, shape index: {}]   ;;  %s2344_s2 = inlined_call_operand.hbm [shape: f32[2,16,128], index: 2, kind: input, shape index: {}]   ;;  %s2345_s3 = inlined_call_operand.hbm [shape: f32[2,16,128], index: 3, kind: input, shape index: {}]   ;;  %s2346_s4 = inlined_call_operand.hbm [shape: f32[2,4,16,128], index: 4, kind: input, shape index: {}]   ;;  %s2347_s5 = inlined_call_operand.hbm [shape: f32[2,4,16,128], index: 5, kind: input, shape index: {}]   ;;  %s2348_s6 = inlined_call_operand.hbm [shape: f32[2,8,128], index: 6, kind: output, shape index: {}]  }
   0x1   :  { %2364 = sst [smem:[#allocation29_spill]] %s2343_s1 }
   0x2   :  { %2365 = sst [smem:[#allocation30_spill]] %s2345_s3 }
   0x3   :  { %2366 = sst [smem:[#allocation31_spill]] %s2348_s6 }
   0x4   :  { %11 = vsyncpa [#allocation4], 0 }
   0x5   :  { %13 = vsyncpa [#allocation4 + $0x1], 0 }
   0x6   :  { %14 = vsyncpa [#allocation7], 0 }
   0x7   :  { %16 = vsyncpa [#allocation7 + $0x1], 0 }
   0x8   :  { %17 = vsyncpa [#allocation10], 0 }
   0x9   :  { %19 = vsyncpa [#allocation10 + $0x1], 0 }
   0xa   :  { %20 = vsyncpa [#allocation13], 0 }
   0xb   :  { %22 = vsyncpa [#allocation13 + $0x1], 0 }
   0xc   :  { %23 = vsyncpa [#allocation5], 0 }
   0xd   :  { %25 = vsyncpa [#allocation5 + $0x1], 0  ;;  %s1706_s21 = smov 0   ;;  %s1708_s22 = smov 0  }
   0xe   :  { %s1710_s23 = smov 0   ;;  %s1712_s24 = smov 0  }
   0xf   :  { %s1714_s25 = smov 0   ;;  %s1716_s26 = smov 0  }
  0x10 LB: > { %2367 = sst [smem:[#allocation20_spill]] %s1636_s21  ;;  %s1737_s27 = sadd.s32 4294967295, %s1656_s26   ;;  %s1656_s26 = sphi %s1716_s26, %s31_s26   ;;  %s1652_s25 = sphi %s1714_s25, %s2401_s25   ;;  %s1648_s24 = sphi %s1712_s24, %s2400_s24   ;;  %s1644_s23 = sphi %s1710_s23, %s2396_s23   ;;  %s1640_s22 = sphi %s1708_s22, %s2399_s22   ;;  %s1636_s21 = sphi %s1706_s21, %s2398_s21  }
  0x11   : > { %2368 = sst [smem:[#allocation21_spill]] %s1644_s23  ;;  %s1161_s28 = sadd.s32 4294967294, %s1656_s26  }
  0x12   : > { %2369 = sst [smem:[#allocation22_spill]] %s1648_s24  ;;  %s50_s29 = sadd.s32 1, %s1652_s25 }
  0x13   : > { %2370 = sst [smem:[#allocation23_spill]] %s1656_s26  ;;  %s61_s30 = sadd.s32 1, %s1644_s23 }
  0x14   : > { %2371 = sst [smem:[#allocation24_spill]] %s1737_s27  ;;  %p52_p0 = scmp.ge.s32.totalorder %s50_s29, 2 }
  0x15   : > { %p68_p1 = scmp.ne.s32.totalorder %s1644_s23, %s1640_s22  ;;  %p69_p2 = scmp.eq.s32.totalorder %s1656_s26, 0 }
  0x16   : > { %p74_p3 = scmp.ne.s32.totalorder %s1640_s22, %s1636_s21  ;;  %s2403_s29 = smov (%p52_p0, %s50_s29), 0 }
  0x17   : > { %2372 = sst [smem:[#allocation25_spill]] %s2403_s29  ;;  %p1749_p4 = por %p69_p2, %p68_p1 }
  0x18   : > { %p75_p5 = scmp.eq.s32.totalorder %s1737_s27, 0  ;;  %s56_s8 = ssub.s32 %s1652_s25, %s2403_s29 }
  0x19   : > { %p250_p6 = scmp.eq.s32.totalorder %s1737_s27, 1  ;;  %p59_p7 = scmp.eq.s32.totalorder %s56_s8, 0 }
  0x1a   : > { %p1757_p8 = por %p75_p5, %p74_p3  ;;  %p256_p10 = scmp.eq.s32.totalorder %s1161_s28, 1 }
  0x1b   : > { %p1761_p9 = por %p250_p6, %p68_p1  ;;  %p1163_p12 = scmp.ge.s32.totalorder %s1656_s26, 2 }
  0x1c   : > { %s1766_s11 = scalar_select %p59_p7, %s1644_s23, %s61_s30  }
  0x1d   : > { %s2375_s10 = scalar_select %p1761_p9, 1, 0 }
  0x1e   : > { %2377 = sst [smem:[#allocation27_spill]] %s1766_s11  ;;  %p1768_p11 = por %p256_p10, %p74_p3 }
  0x1f   : > { %2376 = sst [smem:[#allocation26_spill]] %s2375_s10  ;;  %p1276_p13 = scmp.lt.s32.totalorder %s1656_s26, 2 }
  0x20   : > { %s2378_s12 = scalar_select %p1768_p11, 1, 0 }
  0x21   : > { %s1775_s13 = sand.u32 1, %s1644_s23   ;;  %s2350_s14 = sand.u32 1, %s1656_s26  }
  0x22   : > { %2379 = sst [smem:[#allocation28_spill]] %s2378_s12  ;;  %s1779_s15 = sshll.u32 %s1775_s13, 4 }
  0x23   : > { %p1783_p0 = pnand %p1276_p13, %p1749_p4  ;;  %s1788_s17 = sshll.u32 %s1652_s25, 8 }
  0x24   : > { %s2381_s1 = sld [smem:[#allocation29_spill]]  ;;  %s304_s28 = scalar_lea.vmem [#allocation6], %s1779_s15 }
  0x25   : > { %s314_s30 = sshll.u32 %s304_s28, 4  ;;  %s1797_s8 = scalar_lea.sflag [#allocation7], %s2350_s14  ;;  %s315_s30 = int_to_ptr.vmem [resolvable:$true] %s314_s30 }
  0x26   : > { %p1801_p1 = pneg %p1783_p0  ;;  %s1409_s29 = scalar_lea.vmem %s315_s30, 256 }
  0x27   : > { %p1410_p2 = scmp.ne.s32.totalorder %s315_s30, %s1409_s29  ;;  %s1658_s11 = smov [#allocation6]  }
  0x28   : > { %s1414_s18 = sshll.u32 %s1658_s11, 4  ;;  %s1415_s18 = int_to_ptr.vmem [resolvable:$false] %s1414_s18 }
  0x29   : > { %p1412_p3 = pnand %p1410_p2, %p1801_p1  ;;  %s1416_s19 = scalar_lea.vmem %s1415_s18, 512 }
  0x2a   : > { %s313_s20 = scalar_lea.hbm %s2381_s1, %s1788_s17  ;;  %p1417_p5 = scmp.lt.s32.totalorder %s315_s30, %s1415_s18 }
  0x2b   : > { %p1413_p4 = pneg %p1412_p3  ;;  %p1418_p6 = scmp.lt.s32.totalorder %s1416_s19, %s1409_s29 }
  0x2d   : > { %p1419_p7 = por %p1418_p6, %p1417_p5 }
  0x2f   : > { %p1420_p10 = pnand %p1419_p7, %p1413_p4 }
  0x31   : > { %1423 = shalt.err (!%p1420_p10)
}
  0x32   : > { %s2355_s28 = smov 128   ;;  %s2362_s14 = smov 8  }
  0x33   : > { %1259 = dma.hbm_to_vmem [thread:$0]  (!%p1783_p0), %s313_s20, 256, %s315_s30, %s1797_s8, %s2355_s28, %s2355_s28, %s2362_s14  }
  0x34   : > { %p1182_p13 = scmp.ge.s32.totalorder %s1656_s26, 1  ;;  %p418_p2 = scmp.lt.s32.totalorder %s1656_s26, 3 }
  0x35   : > { %s2384_s3 = sld [smem:[#allocation30_spill]]  ;;  %s352_s1 = scalar_lea.vmem [#allocation9], %s1779_s15 }
  0x36   : > { %p1815_p3 = pnand %p1182_p13, %p418_p2  ;;  %s362_s23 = sshll.u32 %s352_s1, 4  ;;  %s363_s23 = int_to_ptr.vmem [resolvable:$true] %s362_s23 }
  0x37   : > { %s2385_s12 = sand.u32 1, %s1656_s26   ;;  %s1437_s6 = scalar_lea.vmem %s363_s23, 256 }
  0x38   : > { %s1826_s21 = scalar_lea.sflag [#allocation10], %s2385_s12  ;;  %p1438_p4 = scmp.ne.s32.totalorder %s363_s23, %s1437_s6 }
  0x39   : > { %s1661_s20 = smov [#allocation9]  }
  0x3a   : > { %p1440_p5 = pnand %p1438_p4, %p1801_p1  ;;  %s1442_s30 = sshll.u32 %s1661_s20, 4  ;;  %s1443_s30 = int_to_ptr.vmem [resolvable:$false] %s1442_s30 }
  0x3b   : > { %s361_s19 = scalar_lea.hbm %s2384_s3, %s1788_s17  ;;  %s1444_s28 = scalar_lea.vmem %s1443_s30, 512 }
  0x3c   : > { %p1441_p6 = pneg %p1440_p5  ;;  %p1445_p7 = scmp.lt.s32.totalorder %s363_s23, %s1443_s30 }
  0x3d   : > { %p1446_p10 = scmp.lt.s32.totalorder %s1444_s28, %s1437_s6 }
  0x3f   : > { %p1447_p13 = por %p1446_p10, %p1445_p7 }
  0x41   : > { %p1448_p2 = pnand %p1447_p13, %p1441_p6 }
  0x43   : > { %1451 = shalt.err (!%p1448_p2)
}
  0x44   : > { %s2386_s1 = smov 128   ;;  %s1164_s12 = sshll.u32 %s1775_s13, 5 }
  0x45   : > { %1265 = dma.hbm_to_vmem [thread:$0]  (!%p1783_p0), %s361_s19, 256, %s363_s23, %s1826_s21, %s2386_s1, %s2386_s1, %s2362_s14  }
  0x46   : > { %s1214_s11 = sshll.u32 %s1652_s25, 9  ;;  %s280_s28 = scalar_lea.vmem [#allocation3], %s1164_s12 }
  0x47   : > { %s289_s6 = scalar_lea.hbm %s2342_s0, %s1214_s11  ;;  %s290_s30 = sshll.u32 %s280_s28, 4  ;;  %s291_s30 = int_to_ptr.vmem [resolvable:$true] %s290_s30 }
  0x48   : > { %s277_s3 = scalar_lea.sflag [#allocation4], %s1775_s13  ;;  %s1465_s26 = scalar_lea.vmem %s291_s30, 512 }
  0x49   : > { %p1466_p4 = scmp.ne.s32.totalorder %s291_s30, %s1465_s26  ;;  %s1662_s10 = smov [#allocation3]  }
  0x4a   : > { %s1470_s24 = sshll.u32 %s1662_s10, 4  ;;  %s1471_s24 = int_to_ptr.vmem [resolvable:$false] %s1470_s24 }
  0x4b   : > { %p1468_p5 = pnand %p1466_p4, %p1801_p1  ;;  %s1472_s27 = scalar_lea.vmem %s1471_s24, 1024 }
  0x4c   : > { %p1473_p7 = scmp.lt.s32.totalorder %s291_s30, %s1471_s24  ;;  %p1474_p10 = scmp.lt.s32.totalorder %s1472_s27, %s1465_s26 }
  0x4d   : > { %p1469_p6 = pneg %p1468_p5 }
  0x4e   : > { %p1475_p13 = por %p1474_p10, %p1473_p7 }
  0x50   : > { %p1476_p2 = pnand %p1475_p13, %p1469_p6 }
  0x52   : > { %1479 = shalt.err (!%p1476_p2)
}
  0x53   : > { %s1663_s23 = smov 64   ;;  %s1664_s19 = smov 4  }
  0x54   : > { %1256 = dma.hbm_to_vmem [thread:$0]  (!%p1783_p0), %s289_s6, 512, %s291_s30, %s277_s3, %s1663_s23, %s1663_s23, %s1664_s19  }
  0x55   : > { %s337_s10 = scalar_lea.hbm %s2344_s2, %s1788_s17  ;;  %s328_s18 = scalar_lea.vmem [#allocation8], %s1779_s15 }
  0x56   : > { %s338_s20 = sshll.u32 %s328_s18, 4  ;;  %s1176_s24 = sshll.u32 %s1775_s13, 6  ;;  %s339_s20 = int_to_ptr.vmem [resolvable:$true] %s338_s20 }
  0x57   : > { %s1493_s26 = scalar_lea.vmem %s339_s20, 256  ;;  %s1665_s27 = smov [#allocation8]  }
  0x58   : > { %p1494_p4 = scmp.ne.s32.totalorder %s339_s20, %s1493_s26  ;;  %s1498_s28 = sshll.u32 %s1665_s27, 4  ;;  %s1499_s28 = int_to_ptr.vmem [resolvable:$false] %s1498_s28 }
  0x59   : > { %s1500_s14 = scalar_lea.vmem %s1499_s28, 512  ;;  %p1501_p7 = scmp.lt.s32.totalorder %s339_s20, %s1499_s28 }
  0x5a   : > { %p1496_p5 = pnand %p1494_p4, %p1801_p1  ;;  %p1502_p10 = scmp.lt.s32.totalorder %s1500_s14, %s1493_s26 }
  0x5c   : > { %p1497_p6 = pneg %p1496_p5  ;;  %p1503_p13 = por %p1502_p10, %p1501_p7 }
  0x5e   : > { %p1504_p2 = pnand %p1503_p13, %p1497_p6 }
  0x60   : > { %1507 = shalt.err (!%p1504_p2)
}
  0x61   : > { %s2387_s3 = smov 8   ;;  %s1218_s15 = sshll.u32 %s1652_s25, 10 }
  0x62   : > { %1262 = dma.hbm_to_vmem [thread:$0]  (!%p1783_p0), %s337_s10, 256, %s339_s20, %s1797_s8, %s2386_s1, %s2386_s1, %s2387_s3  }
  0x63   : > { %s385_s30 = scalar_lea.hbm %s2346_s4, %s1218_s15  ;;  %s376_s14 = scalar_lea.vmem [#allocation11], %s1176_s24 }
  0x64   : > { %s386_s23 = sshll.u32 %s376_s14, 4  ;;  %s1666_s12 = smov [#allocation11]   ;;  %s387_s23 = int_to_ptr.vmem [resolvable:$true] %s386_s23 }
  0x65   : > { %s1521_s19 = scalar_lea.vmem %s387_s23, 1024  ;;  %s1526_s11 = sshll.u32 %s1666_s12, 4  ;;  %s1527_s11 = int_to_ptr.vmem [resolvable:$false] %s1526_s11 }
  0x66   : > { %p1522_p4 = scmp.ne.s32.totalorder %s387_s23, %s1521_s19  ;;  %s1528_s18 = scalar_lea.vmem %s1527_s11, 2048 }
  0x67   : > { %p1529_p7 = scmp.lt.s32.totalorder %s387_s23, %s1527_s11  ;;  %p1530_p10 = scmp.lt.s32.totalorder %s1528_s18, %s1521_s19 }
  0x68   : > { %p1524_p5 = pnand %p1522_p4, %p1801_p1 }
  0x69   : > { %p1531_p13 = por %p1530_p10, %p1529_p7 }
  0x6a   : > { %p1525_p6 = pneg %p1524_p5 }
  0x6c   : > { %p1532_p2 = pnand %p1531_p13, %p1525_p6 }
  0x6e   : > { %1535 = shalt.err (!%p1532_p2)
}
  0x6f   : > { %1268 = dma.hbm_to_vmem [thread:$0]  (!%p1783_p0), %s385_s30, 1024, %s387_s23, %s1826_s21, %s2386_s1, %s2386_s1, %s2387_s3  }
  0x70   : > { %s409_s20 = scalar_lea.hbm %s2347_s5, %s1218_s15  ;;  %s400_s26 = scalar_lea.vmem [#allocation12], %s1176_s24 }
  0x71   : > { %s410_s27 = sshll.u32 %s400_s26, 4  ;;  %s397_s28 = scalar_lea.sflag [#allocation13], %s1775_s13  ;;  %s411_s27 = int_to_ptr.vmem [resolvable:$true] %s410_s27 }
  0x72   : > { %s1549_s17 = scalar_lea.vmem %s411_s27, 1024  ;;  %s1667_s6 = smov [#allocation12]  }
  0x73   : > { %p1550_p4 = scmp.ne.s32.totalorder %s411_s27, %s1549_s17  ;;  %s1554_s14 = sshll.u32 %s1667_s6, 4  ;;  %s1555_s14 = int_to_ptr.vmem [resolvable:$false] %s1554_s14 }
  0x74   : > { %s1556_s19 = scalar_lea.vmem %s1555_s14, 2048  ;;  %p1557_p7 = scmp.lt.s32.totalorder %s411_s27, %s1555_s14 }
  0x75   : > { %p1552_p5 = pnand %p1550_p4, %p1801_p1  ;;  %p1558_p10 = scmp.lt.s32.totalorder %s1556_s19, %s1549_s17 }
  0x77   : > { %p1553_p6 = pneg %p1552_p5  ;;  %p1559_p13 = por %p1558_p10, %p1557_p7 }
  0x79   : > { %p1560_p2 = pnand %p1559_p13, %p1553_p6 }
  0x7b   : > { %1563 = shalt.err (!%p1560_p2)
}
  0x7c   : > { %1271 = dma.hbm_to_vmem [thread:$0]  (!%p1783_p0), %s409_s20, 1024, %s411_s27, %s397_s28, %s2386_s1, %s2386_s1, %s2387_s3  }
  0x7d   : > { %422 = sbr.rel (%p1815_p3) target bundleno = 266 (0x10a), region = 44  ;;  %s1890_s21 = sand.u32 (!%p1815_p3), 1, %s1640_s22  }
  0x7e   : > { %s1183_s13 = sshll.u32 (!%p1815_p3), %s1890_s21, 5  ;;  %s425_s7 = scalar_lea.sflag (!%p1815_p3), [#allocation4], %s1890_s21 }
  0x7f   : > { %s1894_s24 = scalar_lea.vmem (!%p1815_p3), [#allocation3], %s1183_s13 }
  0x82   : > { %1615 = dma.done.wait (%p1757_p8), %s425_s7, 512  }
  0x83   : > { %1617 = vsyncadd (%p1757_p8), %s425_s7, 4294966784  ;;  %s2388_s16 = sld [smem:[#allocation24_spill]]  ;;  %s1902_s1 = sshll.u32 %s1890_s21, 4 }
  0x84   : > { %s437_s15 = scalar_lea.vmem [#allocation6], %s1902_s1 }
  0x89   : > { %s433_s29 = sand.u32 1, %s2388_s16  }
  0x8a   : > { %s434_s3 = scalar_lea.sflag [#allocation7], %s433_s29 }
  0x8b   : > { %1619 = dma.done.wait (%p1757_p8), %s434_s3, 512  }
  0x8c   : > { %1621 = vsyncadd (%p1757_p8), %s434_s3, 4294966784  ;;  %s446_s30 = scalar_lea.vmem [#allocation8], %s1902_s1  ;;  %s452_s23 = scalar_lea.sflag [#allocation10], %s433_s29 }
  0x8d   : > { %s455_s12 = scalar_lea.vmem [#allocation9], %s1902_s1 }
  0x8e   : > { %1623 = dma.done.wait (%p1757_p8), %s452_s23, 1280  }
  0x8f   : > { %1625 = vsyncadd (%p1757_p8), %s452_s23, 4294966016  ;;  %s1187_s11 = sshll.u32 %s1890_s21, 6  ;;  %s470_s8 = scalar_lea.sflag [#allocation13], %s1890_s21 }
  0x90   : > { %s1916_s18 = scalar_lea.vmem [#allocation11], %s1187_s11  ;;  %s1919_s10 = scalar_lea.vmem [#allocation12], %s1187_s11 }
  0x91   : > { %1627 = dma.done.wait (%p1757_p8), %s470_s8, 1024  }
  0x92   : > { %1629 = vsyncadd (%p1757_p8), %s470_s8, 4294966272  ;;  %v1925_v0 = vld [vmem:[%s437_s15] sm:$0xff]  ;;  %v1927_v1 = vld [vmem:[%s437_s15 + $0x8] sm:$0xff]  ;;  %v1668_v55 = vmov 0.75   ;;  %s2389_s9 = sld [smem:[#allocation22_spill]]  ;;  %s1189_s20 = sshll.u32 %s1890_s21, 3 }
  0x93   : > { %v1221_v2 = vld [vmem:[%s1894_s24] sm:$0xff]   ;;  %v1236_v3 = vld [vmem:[%s1894_s24 + $0x8] sm:$0xff]   ;;  %vm570_vm0 = vcmp.eq.f32.partialorder %v1925_v0, 1.0  ;;  %vm571_vm1 = vcmp.eq.f32.partialorder %v1927_v1, 1.0  ;;  %vm619_vm2 = vcmp.eq.f32.partialorder %v1925_v0, 2.0  ;;  %vm620_vm3 = vcmp.eq.f32.partialorder %v1927_v1, 2.0 }
  0x94   : > { %v1222_v4 = vunpack.c.l.bf16 %v1221_v2  ;;  %v1223_v5 = vunpack.c.h.bf16 %v1221_v2  ;;  %v1226_v6 = vunpack.c.l.bf16 %v1236_v3  ;;  %v1227_v7 = vunpack.c.h.bf16 %v1236_v3  ;;  %v1237_v17 = vld [vmem:[%s1894_s24 + $0x10] sm:$0xff]   ;;  %v1238_v29 = vld [vmem:[%s1894_s24 + $0x18] sm:$0xff]   ;;  %v1988_v50 = vld [vmem:[%s1916_s18] sm:$0xff]  ;;  %s526_s28 = scalar_lea.vmem [#allocation14], %s1189_s20  ;;  %s2391_s19 = sld [smem:[#allocation31_spill]] }
  0x95   : > { %v1230_v25 = vunpack.c.l.bf16 %v1237_v17  ;;  %v1231_v28 = vunpack.c.h.bf16 %v1237_v17  ;;  %vm668_vm4 = vcmp.eq.f32.partialorder %v1925_v0, 3.0  ;;  %vm669_vm5 = vcmp.eq.f32.partialorder %v1927_v1, 3.0  ;;  %v1973_v44 = vld [vmem:[%s446_s30] sm:$0xff]  ;;  %v1977_v45 = vld [vmem:[%s446_s30 + $0x8] sm:$0xff]  ;;  %s945_s17 = sshll.u32 %s526_s28, 4  ;;  %s931_s7 = scalar_lea.sflag [#allocation5], %s1890_s21  ;;  %s946_s17 = int_to_ptr.vmem [resolvable:$true] %s945_s17 }
  0x96   : > { %v574_v8 = vsub.f32 0.0, %v1222_v4  ;;  %v575_v9 = vsub.f32 0.0, %v1223_v5  ;;  %v623_v10 = vsub.f32 0.0, %v1226_v6  ;;  %v624_v13 = vsub.f32 0.0, %v1227_v7  ;;  %v1993_v53 = vld [vmem:[%s1916_s18 + $0x20] sm:$0xff]  ;;  %v2014_v59 = vld [vmem:[%s1916_s18 + $0x28] sm:$0xff] }
  0x97   : > { %v672_v32 = vsub.f32 0.0, %v1230_v25  ;;  %v673_v33 = vsub.f32 0.0, %v1231_v28  ;;  %v1234_v34 = vunpack.c.l.bf16 %v1238_v29  ;;  %v1235_v35 = vunpack.c.h.bf16 %v1238_v29  ;;  %v1996_v54 = vld [vmem:[%s1919_s10 + $0x20] sm:$0xff]  ;;  %v2020_v61 = vld [vmem:[%s1919_s10 + $0x28] sm:$0xff]  ;;  %v2049_v17 = vld [vmem:[%s1916_s18 + $0x38] sm:$0xff]  ;;  %s1564_s24 = scalar_lea.vmem %s946_s17, 128 }
  0x98   : > { %v1936_v11 = vsel %vm570_vm0, %v574_v8, %v1222_v4  ;;  %v1940_v12 = vsel %vm571_vm1, %v575_v9, %v1223_v5  ;;  %v1947_v16 = vsel %vm619_vm2, %v623_v10, %v1226_v6  ;;  %v1952_v20 = vsel %vm620_vm3, %v624_v13, %v1227_v7  ;;  %v2017_v60 = vld [vmem:[%s1919_s10] sm:$0xff]  ;;  %v2028_v3 = vld [vmem:[%s1916_s18 + $0x8] sm:$0xff]  ;;  %v2038_v8 = vld [vmem:[%s1916_s18 + $0x30] sm:$0xff]  ;;  %s1211_s27 = sshll.u32 %s2389_s9, 7  ;;  %p1565_p8 = scmp.ne.s32.totalorder %s946_s17, %s1564_s24 }
  0x99   : > { %v578_v14 = vand.u32 2147483647, %v1936_v11  ;;  %v579_v15 = vand.u32 2147483647, %v1940_v12  ;;  %v627_v21 = vand.u32 2147483647, %v1947_v16  ;;  %v1961_v36 = vsel %vm668_vm4, %v672_v32, %v1230_v25 }
  0x9a   : > { %v628_v22 = vand.u32 2147483647, %v1952_v20  ;;  %v1965_v37 = vsel %vm669_vm5, %v673_v33, %v1231_v28  ;;  %v676_v38 = vand.u32 2147483647, %v1961_v36  ;;  %vm717_vm6 = vcmp.eq.f32.partialorder %v1925_v0, 4.0  ;;  %v2031_v4 = vld [vmem:[%s1919_s10 + $0x8] sm:$0xff]  ;;  %s2300_s13 = scalar_lea.hbm %s2391_s19, %s1211_s27  ;;  %p1566_p0 = pnand %p1565_p8, %p1761_p9 }
  0x9b   : > { %v580_v18 = vsub.f32 0.0, %v578_v14  ;;  %v581_v19 = vsub.f32 0.0, %v579_v15  ;;  %v629_v26 = vsub.f32 0.0, %v627_v21  ;;  %v677_v39 = vand.u32 2147483647, %v1965_v37  ;;  %v2041_v9 = vld [vmem:[%s1919_s10 + $0x30] sm:$0xff] }
  0x9c   : > { %v630_v27 = vsub.f32 0.0, %v628_v22  ;;  %vm718_vm7 = vcmp.eq.f32.partialorder %v1927_v1, 4.0  ;;  %v678_v40 = vsub.f32 0.0, %v676_v38  ;;  %v721_v42 = vsub.f32 0.0, %v1234_v34  ;;  %v2060_v25 = vld [vmem:[%s1916_s18 + $0x10] sm:$0xff]  ;;  %v2067_v29 = vld [vmem:[%s1916_s18 + $0x18] sm:$0xff]  ;;  %p1567_p1 = pneg %p1566_p0 }
  0x9d   : > { %v582_v23 = vmul.f32 1.442695, %v580_v18  ;;  %v584_v24 = vmul.f32 1.442695, %v581_v19  ;;  %v631_v30 = vmul.f32 1.442695, %v629_v26  ;;  %v821_v10 = vmin.f32 %v1993_v53, %v1996_v54 }
  0x9e   : > { %v633_v31 = vmul.f32 1.442695, %v630_v27  ;;  %v679_v41 = vsub.f32 0.0, %v677_v39  ;;  %v722_v43 = vsub.f32 0.0, %v1235_v35  ;;  %v680_v46 = vmul.f32 1.442695, %v678_v40 }
  0x9f   : > { %1332 = vpow2.f32 %v582_v23  ;;  %v1981_v48 = vsel %vm717_vm6, %v721_v42, %v1234_v34  ;;  %v2001_v56 = vsel %vm570_vm0, 0.25, %v1668_v55  ;;  %v2006_v57 = vsel %vm571_vm1, 0.25, %v1668_v55  ;;  %v2052_v18 = vld [vmem:[%s1919_s10 + $0x38] sm:$0xff]  ;;  %s1670_s16 = smov [#allocation14]  }
  0xa0   : > { %1334 = vpow2.f32 %v584_v24  ;;  %v682_v47 = vmul.f32 1.442695, %v679_v41  ;;  %v1985_v49 = vsel %vm718_vm7, %v722_v43, %v1235_v35  ;;  %v725_v51 = vand.u32 2147483647, %v1981_v48  ;;  %s1568_s29 = sshll.u32 %s1670_s16, 4  ;;  %s1569_s29 = int_to_ptr.vmem [resolvable:$false] %s1568_s29 }
  0xa1   : > { %1336 = vpow2.f32 %v631_v30  ;;  %v726_v52 = vand.u32 2147483647, %v1985_v49  ;;  %v2011_v58 = vsel %vm619_vm2, 0.25, %v1668_v55  ;;  %v2025_v62 = vsel %vm620_vm3, 0.25, %v1668_v55  ;;  %v2070_v30 = vld [vmem:[%s1919_s10 + $0x10] sm:$0xff]  ;;  %s1570_s1 = scalar_lea.vmem %s1569_s29, 256  ;;  %p1571_p3 = scmp.lt.s32.totalorder %s946_s17, %s1569_s29 }
  0xa2   : > { %1338 = vpow2.f32 %v633_v31  ;;  %v727_v63 = vsub.f32 0.0, %v725_v51  ;;  %v774_v6 = vand.u32 2147483647, %v1973_v44  ;;  %v775_v7 = vand.u32 2147483647, %v1977_v45  ;;  %v2073_v31 = vld [vmem:[%s1919_s10 + $0x18] sm:$0xff]  ;;  %p1572_p4 = scmp.lt.s32.totalorder %s1570_s1, %s1564_s24 }
  0xa3   : > { %1340 = vpow2.f32 %v680_v46  ;;  %v728_v2 = vsub.f32 0.0, %v726_v52  ;;  %v822_v19 = vmin.f32 %v2014_v59, %v2020_v61  ;;  %v823_v21 = vmin.f32 %v1988_v50, %v2017_v60 }
  0xa4   : > { %1342 = vpow2.f32 %v682_v47  ;;  %v729_v15 = vmul.f32 1.442695, %v727_v63  ;;  %v776_v23 = vsub.f32 0.0, %v774_v6  ;;  %v777_v24 = vsub.f32 0.0, %v775_v7  ;;  %p1573_p5 = por %p1572_p4, %p1571_p3 }
  0xa5   : > { %v824_v26 = vmin.f32 %v2028_v3, %v2031_v4  ;;  %v731_v28 = vmul.f32 1.442695, %v728_v2  ;;  %v825_v32 = vadd.f32 %v823_v21, %v821_v10  ;;  %v829_v33 = vmin.f32 %v2038_v8, %v2041_v9 }
  0xa6   : > { %v778_v38 = vmul.f32 1.442695, %v776_v23  ;;  %v830_v39 = vmin.f32 %v2049_v17, %v2052_v18  ;;  %v780_v41 = vmul.f32 1.442695, %v777_v24  ;;  %v831_v43 = vmin.f32 %v2060_v25, %v2070_v30  ;;  %p1574_p6 = pnand %p1573_p5, %p1567_p1 }
  0xa7   : > { %v826_v42 = vadd.f32 %v824_v26, %v822_v19  ;;  %v832_v46 = vmin.f32 %v2067_v29, %v2073_v31  ;;  %v839_v47 = vadd.f32 %v1993_v53, %v1988_v50  ;;  %v827_v51 = vmax.f32 %v825_v32, 0.0 }
  0xa8   : > { %v840_v52 = vadd.f32 %v2014_v59, %v2028_v3  ;;  %v841_v63 = vadd.f32 %v2038_v8, %v2060_v25  ;;  %v833_v2 = vadd.f32 %v831_v43, %v829_v33  ;;  %v842_v7 = vadd.f32 %v2049_v17, %v2067_v29 }
  0xa9   : > { %v834_v6 = vadd.f32 %v832_v46, %v830_v39  ;;  %v828_v10 = vmax.f32 %v826_v42, 0.0  ;;  %v846_v19 = vadd.f32 %v2020_v61, %v2031_v4  ;;  %vm590_vm8 = vcmp.ge.f32.partialorder %v1936_v11, 0.0 }
  0xaa   : > { %v835_v21 = vmax.f32 %v833_v2, 0.0  ;;  %v843_v23 = vmul.f32 %v841_v63, %v839_v47  ;;  %v844_v26 = vmul.f32 %v842_v7, %v840_v52  ;;  %v847_v32 = vadd.f32 %v2041_v9, %v2070_v30 }
  0xab   : > { %v848_v33 = vadd.f32 %v2052_v18, %v2073_v31  ;;  %v868_v52 = vmax.f32 %v2014_v59, %v2020_v61  ;;  %v869_v63 = vmax.f32 %v1988_v50, %v2017_v60  ;;  %vm591_vm9 = vcmp.ge.f32.partialorder %v1940_v12, 0.0 }
  0xac   : > { %v2033_v5 = vpop.eup %1332  ;;  %v2109_v42 = vmul.f32 %v835_v21, %v827_v51  ;;  %v597_v2 = vmax.f32 %v1940_v12, 0.0  ;;  %vm639_vm10 = vcmp.ge.f32.partialorder %v1947_v16, 0.0  ;;  %vm640_vm11 = vcmp.ge.f32.partialorder %v1952_v20, 0.0 }
  0xad   : > { %v2045_v13 = vpop.eup %1334  ;;  %v586_v14 = vadd.f32 1.0, %v2033_v5  ;;  %v850_v46 = vmul.f32 %v848_v33, %v846_v19  ;;  %v645_v7 = vmax.f32 %v1947_v16, 0.0  ;;  %vm688_vm12 = vcmp.ge.f32.partialorder %v1961_v36, 0.0 }
  0xae   : > { %v587_v22 = vadd.f32 1.0, %v2045_v13  ;;  %v2064_v27 = vpop.eup %1336  ;;  %vm689_vm13 = vcmp.ge.f32.partialorder %v1965_v37, 0.0  ;;  %v878_v16 = vmax.f32 %v2067_v29, %v2073_v31  ;;  %vm551_vm14 = vcmp.ge.f32.partialorder %v1925_v0, 0.0 }
  0xaf   : > { %1344 = vrcp.f32 %v586_v14  ;;  %v2077_v34 = vpop.eup %1338  ;;  %v635_v35 = vadd.f32 1.0, %v2064_v27  ;;  %v852_v51 = vadd.f32 %v850_v46, %v844_v26  ;;  %v695_v26 = vmax.f32 %v1965_v37, 0.0 }
  0xb0   : > { %1346 = vrcp.f32 %v587_v22  ;;  %v636_v40 = vadd.f32 1.0, %v2077_v34  ;;  %v2100_v24 = vpop.eup %1340  ;;  %vm552_vm15 = vcmp.ge.f32.partialorder %v1927_v1, 0.0  ;;  %vm737_vm2 = vcmp.ge.f32.partialorder %v1981_v48, 0.0 }
  0xb1   : > { %1348 = vlog2.f32 %v586_v14  ;;  %v845_v14 = vadd.f32 %v1996_v54, %v2017_v60  ;;  %v684_v39 = vadd.f32 1.0, %v2100_v24  ;;  %vm738_vm3 = vcmp.ge.f32.partialorder %v1985_v49, 0.0 }
  0xb2   : > { %1350 = vlog2.f32 %v587_v22  ;;  %v836_v22 = vmax.f32 %v834_v6, 0.0 }
  0xb3   : > { %1352 = vrcp.f32 %v635_v35 }
  0xb4   : > { %1354 = vrcp.f32 %v636_v40  ;;  %v2114_v47 = vmul.f32 %v836_v22, %v828_v10 }
  0xb5   : > { %1356 = vlog2.f32 %v635_v35  ;;  %v2106_v35 = vpop.eup %1342 }
  0xb6   : > { %1358 = vlog2.f32 %v636_v40  ;;  %v867_v40 = vmax.f32 %v1993_v53, %v1996_v54  ;;  %v685_v43 = vadd.f32 1.0, %v2106_v35  ;;  %v870_v53 = vmax.f32 %v2028_v3, %v2031_v4 }
  0xb7   : > { %1360 = vpow2.f32 %v729_v15  ;;  %v849_v15 = vmul.f32 %v847_v32, %v845_v14  ;;  %v2133_v3 = vsub.f32 %v852_v51, %v2114_v47 }
  0xb8   : > { %1362 = vpow2.f32 %v731_v28  ;;  %v2137_v10 = vadd.f32 %v869_v63, %v867_v40  ;;  %v2139_v14 = vadd.f32 %v870_v53, %v868_v52  ;;  %v876_v63 = vmax.f32 %v2049_v17, %v2052_v18 }
  0xb9   : > { %1364 = vpow2.f32 %v778_v38  ;;  %v851_v28 = vadd.f32 %v849_v15, %v843_v23  ;;  %v596_v38 = vmax.f32 %v1936_v11, 0.0  ;;  %v856_v15 = vmax.f32 %v2133_v3, 1e-10 }
  0xba   : > { %1366 = vrcp.f32 %v684_v39  ;;  %v873_v52 = vmax.f32 %v2137_v10, 0.0  ;;  %v874_v11 = vmax.f32 %v2139_v14, 0.0  ;;  %v877_v53 = vmax.f32 %v2060_v25, %v2070_v30 }
  0xbb   : > { %1368 = vrcp.f32 %v685_v43  ;;  %v2128_v50 = vsub.f32 %v851_v28, %v2109_v42  ;;  %v768_v14 = vmax.f32 %v1973_v44, 0.0 }
  0xbc   : > { %v1345_v54 = vpop.eup %1344  ;;  %1370 = vlog2.f32 %v684_v39 }
  0xbd   : > { %v1347_v6 = vpop.eup %1346  ;;  %v592_v59 = vmul.f32 %v1345_v54, %v2033_v5  ;;  %1372 = vlog2.f32 %v685_v43  ;;  %v646_v5 = vmax.f32 %v1952_v20, 0.0  ;;  %v855_v32 = vmax.f32 %v2128_v50, 1e-10 }
  0xbe   : > { %v1349_v60 = vpop.eup %1348  ;;  %v593_v61 = vmul.f32 %v1347_v6, %v2045_v13  ;;  %1374 = vpow2.f32 %v780_v41  ;;  %v694_v13 = vmax.f32 %v1961_v36, 0.0  ;;  %v720_v36 = vsel %vm718_vm7, 0.25, %v1668_v55 }
  0xbf   : > { %v1351_v4 = vpop.eup %1350  ;;  %v599_v21 = vmul.f32 0.6931472, %v1349_v60  ;;  %v594_v22 = vsel %vm590_vm8, %v1345_v54, %v592_v59  ;;  %1376 = vrcp.f32 %v855_v32 }
  0xc0   : > { %v1353_v19 = vpop.eup %1352  ;;  %v595_v39 = vsel %vm591_vm9, %v1347_v6, %v593_v61  ;;  %v601_v40 = vmul.f32 0.6931472, %v1351_v4  ;;  %v604_v51 = vmul.f32 %v594_v22, %v594_v22  ;;  %1378 = vrcp.f32 %v856_v15 }
  0xc1   : > { %v1355_v41 = vpop.eup %1354  ;;  %v641_v23 = vmul.f32 %v1353_v19, %v2064_v27  ;;  %v875_v27 = vmax.f32 %v2038_v8, %v2041_v9  ;;  %v602_v12 = vadd.f32 %v599_v21, %v596_v38  ;;  %v605_v6 = vmul.f32 %v595_v39, %v595_v39 }
  0xc2   : > { %v1357_v33 = vpop.eup %1356  ;;  %v642_v43 = vmul.f32 %v1355_v41, %v2077_v34  ;;  %v603_v17 = vadd.f32 %v601_v40, %v597_v2  ;;  %v606_v61 = vmul.f32 %v604_v51, %v2001_v56  ;;  %v880_v56 = vadd.f32 %v878_v16, %v876_v63  ;;  %v2191_v63 = vld [vmem:[%s455_s12] sm:$0xff] }
  0xc3   : > { %v1359_v46 = vpop.eup %1358  ;;  %v643_v34 = vsel %vm639_vm10, %v1353_v19, %v641_v23  ;;  %v648_v30 = vmul.f32 0.6931472, %v1357_v33  ;;  %v879_v31 = vadd.f32 %v877_v53, %v875_v27  ;;  %v607_v22 = vmul.f32 %v605_v6, %v2006_v57 }
  0xc4   : > { %v2159_v28 = vpop.eup %1360  ;;  %v644_v59 = vsel %vm640_vm11, %v1355_v41, %v642_v43  ;;  %v650_v38 = vmul.f32 0.6931472, %v1359_v46  ;;  %v653_v20 = vmul.f32 %v643_v34, %v643_v34  ;;  %vm553_vm0 = vcmp.gt.f32.partialorder %v2191_v63, -1.0 }
  0xc5   : > { %v2165_v54 = vpop.eup %1362  ;;  %v733_v8 = vadd.f32 1.0, %v2159_v28  ;;  %v654_v4 = vmul.f32 %v644_v59, %v644_v59  ;;  %v881_v53 = vmax.f32 %v879_v31, 0.0  ;;  %v608_v6 = vmul.f32 %v606_v61, %v602_v12 }
  0xc6   : > { %v1365_v9 = vpop.eup %1364  ;;  %v734_v18 = vadd.f32 1.0, %v2165_v54  ;;  %v652_v39 = vadd.f32 %v650_v38, %v646_v5  ;;  %v655_v40 = vmul.f32 %v653_v20, %v2011_v58  ;;  %v670_v58 = vsel %vm668_vm4, 0.25, %v1668_v55 }
  0xc7   : > { %v1367_v25 = vpop.eup %1366  ;;  %1380 = vrcp.f32 %v733_v8  ;;  %v782_v29 = vadd.f32 1.0, %v1365_v9  ;;  %v656_v43 = vmul.f32 %v654_v4, %v2025_v62  ;;  %v719_v62 = vsel %vm717_vm6, 0.25, %v1668_v55  ;;  %v2209_v9 = vld [vmem:[%s455_s12 + $0x8] sm:$0xff] }
  0xc8   : > { %v1369_v60 = vpop.eup %1368  ;;  %v690_v2 = vmul.f32 %v1367_v25, %v2100_v24  ;;  %1382 = vrcp.f32 %v734_v18  ;;  %v651_v24 = vadd.f32 %v648_v30, %v645_v7  ;;  %v671_v7 = vsel %vm669_vm5, 0.25, %v1668_v55 }
  0xc9   : > { %v1371_v19 = vpop.eup %1370  ;;  %v691_v21 = vmul.f32 %v1369_v60, %v2106_v35  ;;  %1384 = vlog2.f32 %v733_v8  ;;  %v882_v5 = vmax.f32 %v880_v56, 0.0  ;;  %v609_v59 = vmul.f32 %v607_v22, %v603_v17 }
  0xca   : > { %v1373_v41 = vpop.eup %1372  ;;  %v692_v23 = vsel %vm688_vm12, %v1367_v25, %v690_v2  ;;  %1386 = vlog2.f32 %v734_v18  ;;  %v697_v46 = vmul.f32 0.6931472, %v1371_v19  ;;  %v2205_v8 = vmul.f32 %v881_v53, %v873_v52 }
  0xcb   : > { %v1375_v33 = vpop.eup %1374  ;;  %v693_v35 = vsel %vm689_vm13, %v1369_v60, %v691_v21  ;;  %v699_v27 = vmul.f32 0.6931472, %v1373_v41  ;;  %v702_v57 = vmul.f32 %v692_v23, %v692_v23  ;;  %1388 = vlog2.f32 %v782_v29 }
  0xcc   : > { %v703_v51 = vmul.f32 %v693_v35, %v693_v35  ;;  %v783_v34 = vadd.f32 1.0, %v1375_v33  ;;  %v657_v18 = vmul.f32 %v655_v40, %v651_v24  ;;  %v658_v16 = vmul.f32 %v656_v43, %v652_v39  ;;  %v2221_v38 = vpop.eup %1376 }
  0xcd   : > { %v700_v25 = vadd.f32 %v697_v46, %v694_v13  ;;  %v2215_v30 = vmul.f32 %v882_v5, %v874_v11  ;;  %vm554_vm1 = vcmp.gt.f32.partialorder %v2209_v9, -1.0  ;;  %v701_v12 = vadd.f32 %v699_v27, %v695_v26  ;;  %v2230_v11 = vpop.eup %1378 }
  0xce   : > { %1390 = vlog2.f32 %v783_v34  ;;  %v704_v10 = vmul.f32 %v702_v57, %v670_v58  ;;  %v705_v52 = vmul.f32 %v703_v51, %v671_v7  ;;  %v887_v17 = vmax.f32 %v2205_v8, 1e-10 }
  0xcf   : > { %v770_v13 = vmul.f32 %v2191_v63, %v1973_v44  ;;  %v610_v37 = vsel %vm551_vm14, %v608_v6, 0.0  ;;  %v743_v26 = vmax.f32 %v1981_v48, 0.0  ;;  %v888_v20 = vmax.f32 %v2215_v30, 1e-10 }
  0xd0   : > { %v611_v55 = vsel %vm552_vm15, %v609_v59, 0.0  ;;  %v659_v61 = vsel %vm551_vm14, %v657_v18, 0.0  ;;  %v660_v44 = vsel %vm552_vm15, %v658_v16, 0.0  ;;  %1392 = vrcp.f32 %v887_v17 }
  0xd1   : > { %v706_v2 = vmul.f32 %v704_v10, %v700_v25  ;;  %v707_v19 = vmul.f32 %v705_v52, %v701_v12  ;;  %1394 = vrcp.f32 %v888_v20  ;;  %v744_v41 = vmax.f32 %v1985_v49, 0.0 }
  0xd2   : > { %v769_v22 = vmax.f32 %v1977_v45, 0.0  ;;  %v771_v23 = vmul.f32 %v2209_v9, %v1977_v45  ;;  %v661_v33 = vadd.f32 %v659_v61, %v610_v37  ;;  %v662_v40 = vadd.f32 %v660_v44, %v611_v55 }
  0xd3   : > { %v708_v46 = vsel %vm551_vm14, %v706_v2, 0.0  ;;  %v709_v27 = vsel %vm552_vm15, %v707_v19, 0.0  ;;  %v1669_v34 = vmov 0.0   ;;  %v859_v49 = vmul.f32 %v2221_v38, %v855_v32 }
  0xd4   : > { %v1381_v60 = vpop.eup %1380  ;;  %v1190_v48 = vsel %vm553_vm0, 1.0, %v1669_v34  ;;  %v773_v5 = vsub.f32 %v769_v22, %v771_v23  ;;  %v860_v59 = vmul.f32 %v2230_v11, %v856_v15  ;;  %v1191_v16 = vsel %vm554_vm1, 1.0, %v1669_v34 }
  0xd5   : > { %v1383_v4 = vpop.eup %1382  ;;  %v739_v21 = vmul.f32 %v1381_v60, %v2159_v28  ;;  %v772_v28 = vsub.f32 %v768_v14, %v770_v13  ;;  %v710_v25 = vadd.f32 %v708_v46, %v661_v33  ;;  %v711_v12 = vadd.f32 %v709_v27, %v662_v40 }
  0xd6   : > { %v1385_v29 = vpop.eup %1384  ;;  %v740_v31 = vmul.f32 %v1383_v4, %v2165_v54  ;;  %v559_v13 = vadd.f32 %v1191_v16, %v1190_v48  ;;  %v862_v15 = vsub.f32 2.0, %v860_v59  ;;  %v885_v22 = vsub.f32 %v2205_v8, %v2128_v50 }
  0xd7   : > { %v1387_v56 = vpop.eup %1386  ;;  %v741_v24 = vsel %vm737_vm2, %v1381_v60, %v739_v21  ;;  %v746_v39 = vmul.f32 0.6931472, %v1385_v29  ;;  %v912_v34 = vlaneseq }
  0xd8   : > { %v742_v35 = vsel %vm738_vm3, %v1383_v4, %v740_v31  ;;  %v748_v43 = vmul.f32 0.6931472, %v1387_v56  ;;  %v751_v54 = vmul.f32 %v741_v24, %v741_v24  ;;  %v1389_v51 = vpop.eup %1388  ;;  %v560_v21 = vrot.slane %v559_v13, 4 }
  0xd9   : > { %v749_v45 = vadd.f32 %v746_v39, %v743_v26  ;;  %v752_v57 = vmul.f32 %v742_v35, %v742_v35  ;;  %v785_v6 = vmul.f32 0.6931472, %v1389_v51  ;;  %v864_v29 = vmul.f32 %v2230_v11, %v862_v15 }
  0xda   : > { %v750_v53 = vadd.f32 %v748_v43, %v744_v41  ;;  %v753_v58 = vmul.f32 %v751_v54, %v719_v62  ;;  %v886_v56 = vsub.f32 %v2215_v30, %v2133_v3 }
  0xdb   : > { %v754_v7 = vmul.f32 %v752_v57, %v720_v36  ;;  %v1391_v18 = vpop.eup %1390  ;;  %v788_v14 = vadd.f32 %v785_v6, %v772_v28  ;;  %v861_v36 = vsub.f32 2.0, %v859_v49  ;;  %v866_v28 = vmul.f32 %v864_v29, %v2114_v47 }
  0xdc   : > { %v755_v10 = vmul.f32 %v753_v58, %v749_v45  ;;  %v787_v62 = vmul.f32 0.6931472, %v1391_v18 }
  0xdd   : > { %v756_v52 = vmul.f32 %v754_v7, %v750_v53  ;;  %v790_v61 = vsel %vm553_vm0, %v788_v14, 0.0  ;;  %v1393_v44 = vpop.eup %1392  ;;  %v863_v0 = vmul.f32 %v2221_v38, %v861_v36 }
  0xde   : > { %v757_v32 = vsel %vm551_vm14, %v755_v10, 0.0  ;;  %v789_v26 = vadd.f32 %v787_v62, %v773_v5  ;;  %v1395_v2 = vpop.eup %1394  ;;  %v891_v19 = vmul.f32 %v1393_v44, %v887_v17  ;;  %v561_v17 = vadd.f32 %v560_v21, %v559_v13 }
  0xdf   : > { %v758_v37 = vsel %vm552_vm15, %v756_v52, 0.0  ;;  %v759_v60 = vadd.f32 %v757_v32, %v710_v25  ;;  %v892_v31 = vmul.f32 %v1395_v2, %v888_v20  ;;  %v865_v38 = vmul.f32 %v863_v0, %v2109_v42 }
  0xe0   : > { %v760_v55 = vadd.f32 %v758_v37, %v711_v12  ;;  %v791_v4 = vsel %vm554_vm1, %v789_v26, 0.0  ;;  %v893_v23 = vsub.f32 2.0, %v891_v19  ;;  %v562_v54 = vrot.slane %v561_v17, 2 }
  0xe1   : > { %v792_v1 = vadd.f32 %v791_v4, %v790_v61  ;;  %v894_v33 = vsub.f32 2.0, %v892_v31  ;;  %v913_v5 = vshrl.u32 %v912_v34, 7 }
  0xe2   : > { %v761_v41 = vadd.f32 %v760_v55, %v759_v60  ;;  %v895_v24 = vmul.f32 %v1393_v44, %v893_v23  ;;  %v563_v30 = vadd.f32 %v562_v54, %v561_v17 }
  0xe3   : > { %v793_v39 = vrot.slane %v792_v1, 4  ;;  %v896_v11 = vmul.f32 %v1395_v2, %v894_v33  ;;  %vm917_vm4 = vcmp.eq.s32.totalorder %v913_v5, 3  ;;  %vm916_vm5 = vcmp.eq.s32.totalorder %v913_v5, 2 }
  0xe4   : > { %v762_v40 = vrot.slane %v761_v41, 4  ;;  %v897_v35 = vmul.f32 %v895_v24, %v885_v22  ;;  %v564_v53 = vrot.slane %v563_v30, 1  ;;  %vm915_vm6 = vcmp.eq.s32.totalorder %v913_v5, 1 }
  0xe5   : > { %v898_v20 = vmul.f32 %v896_v11, %v886_v56  ;;  %v794_v46 = vadd.f32 %v793_v39, %v792_v1  ;;  %vm914_vm7 = vcmp.eq.s32.totalorder %v913_v5, 0 }
  0xe6   : > { %v899_v43 = vsub.f32 %v865_v38, %v897_v35  ;;  %v763_v8 = vadd.f32 %v762_v40, %v761_v41  ;;  %v565_v59 = vadd.f32 %v564_v53, %v563_v30 }
  0xe7   : > { %v900_v50 = vsub.f32 %v866_v28, %v898_v20  ;;  %v795_v45 = vrot.slane %v794_v46, 2 }
  0xe8   : > { %v901_v27 = vsub.f32 1.0, %v899_v43  ;;  %v764_v57 = vrot.slane %v763_v8, 2  ;;  %v918_v12 = vsel %vm917_vm4, %v565_v59, 0.0 }
  0xe9   : > { %v902_v3 = vsub.f32 1.0, %v900_v50  ;;  %v796_v58 = vadd.f32 %v795_v45, %v794_v46 }
  0xea   : > { %v903_v42 = vsel %vm553_vm0, %v901_v27, 0.0  ;;  %v765_v49 = vadd.f32 %v764_v57, %v763_v8 }
  0xeb   : > { %v904_v47 = vsel %vm554_vm1, %v902_v3, 0.0  ;;  %v797_v63 = vrot.slane %v796_v58, 1 }
  0xec   : > { %v905_v51 = vadd.f32 %v904_v47, %v903_v42  ;;  %v766_v18 = vrot.slane %v765_v49, 1 }
  0xed   : > { %v798_v9 = vadd.f32 %v797_v63, %v796_v58 }
  0xee   : > { %v906_v48 = vrot.slane %v905_v51, 4  ;;  %v767_v10 = vadd.f32 %v766_v18, %v765_v49 }
  0xf0   : > { %v907_v7 = vadd.f32 %v906_v48, %v905_v51 }
  0xf2   : > { %v908_v6 = vrot.slane %v907_v7, 2 }
  0xf4   : > { %v909_v16 = vadd.f32 %v908_v6, %v907_v7 }
  0xf6   : > { %v910_v25 = vrot.slane %v909_v16, 1 }
  0xf8   : > { %v911_v52 = vadd.f32 %v910_v25, %v909_v16 }
  0xfa   : > { %v919_v62 = vsel %vm916_vm5, %v911_v52, %v918_v12 }
  0xfb   : > { %v920_v14 = vsel %vm915_vm6, %v798_v9, %v919_v62 }
  0xfc   : > { %v921_v32 = vsel %vm914_vm7, %v767_v10, %v920_v14 }
  0xfd   : > { %929 = vst [vmem:[%s526_s28] sm:$0xff] %v921_v32 }
  0xfe   : > { %1577 = shalt.err (!%p1574_p6)
}
  0xff   : > { %s1578_s3 = scalar_lea.hbm %s2300_s13, 128  ;;  %s1582_s30 = scalar_lea.hbm %s2391_s19, 256 }
 0x100   : > { %p1579_p7 = scmp.ne.s32.totalorder %s2300_s13, %s1578_s3  ;;  %p1583_p2 = scmp.lt.s32.totalorder %s2300_s13, %s2391_s19 }
 0x101   : > { %p1584_p8 = scmp.lt.s32.totalorder %s1582_s30, %s1578_s3 }
 0x102   : > { %p1580_p10 = pnand %p1579_p7, %p1761_p9 }
 0x103   : > { %p1585_p0 = por %p1584_p8, %p1583_p2 }
 0x104   : > { %p1581_p13 = pneg %p1580_p10 }
 0x106   : > { %p1586_p1 = pnand %p1585_p0, %p1581_p13 }
 0x108   : > { %1589 = shalt.err (!%p1586_p1)
}
 0x109   : > { %1251 = dma.vmem_to_hbm [thread:$0]  (%p1761_p9), %s946_s17, 128, %s2300_s13, %s931_s7  }
 0x10a PF: > { %s2392_s11 = sld [smem:[#allocation20_spill]]  ;;  %p1273_p3 = pnand %p1163_p12, %p1768_p11 }
 0x10b   : > { %s2394_s8 = sld [smem:[#allocation23_spill]] }
 0x10c   : > { %p1274_p4 = pneg %p1273_p3 }
 0x110   : > { %s957_s10 = sand.u32 1, %s2392_s11  }
 0x111   : > { %s958_s9 = scalar_lea.sflag [#allocation5], %s957_s10 }
 0x112   : > { %1631 = dma.done.wait (%p1274_p4), %s958_s9, 128  }
 0x113   : > { %1633 = vsyncadd (%p1274_p4), %s958_s9, 4294967168  ;;  %s31_s26 = sadd.s32 1, %s2394_s8   ;;  %s2395_s20 = sld [smem:[#allocation21_spill]] }
 0x114   : > { %p28_p5 = scmp.ge.s32.totalorder %s31_s26, 4   ;;  %s2396_s23 = sld [smem:[#allocation27_spill]] }
 0x115   : > { %s2397_s27 = sld [smem:[#allocation25_spill]]  ;;  %s2398_s21 = smov %s1640_s22 }
 0x116   : > { %s2400_s24 = smov %s1652_s25 }
 0x117   :  { %30 = sbr.rel (!%p28_p5) target bundleno = 16 (0x10), region = 167 }
 0x119   : > { %s2399_s22 = smov %s2395_s20 }
 0x11b   : > { %s2401_s25 = smov %s2397_s27 }
 0x11c   :  { %963 = vsyncpa [#allocation4], 1 }
 0x11d   :  { %965 = vsyncpa [#allocation4 + $0x1], 1 }
 0x11e   :  { %966 = vsyncpa [#allocation7], 1 }
 0x11f   :  { %968 = vsyncpa [#allocation7 + $0x1], 1 }
 0x120   :  { %969 = vsyncpa [#allocation10], 1 }
 0x121   :  { %971 = vsyncpa [#allocation10 + $0x1], 1 }
 0x122   :  { %972 = vsyncpa [#allocation13], 1 }
 0x123   :  { %974 = vsyncpa [#allocation13 + $0x1], 1 }
 0x124   :  { %975 = vsyncpa [#allocation5], 1 }
 0x125   :  { %977 = vsyncpa [#allocation5 + $0x1], 1 }

</bundles_post_ra>
